<compile_context>
chip_gen: v7x
topology: tpu7x:2x2x1
jax: 0.10.0
libtpu: 0.0.40
codegen_flags: <defaults>
</compile_context>

<pallas_src>
import functools
import math

import jax
import jax.numpy as jnp
from jax import lax
from jax.experimental import pallas as pl
from jax.experimental.pallas import tpu as pltpu


def _round_up(x, m):
    return (x + m - 1) // m * m


def _l2_normalize_rows(a):
    # F.normalize(a, dim=-1): a / max(||a||, 1e-12) == a * rsqrt(max(sumsq, 1e-24))
    return a * lax.rsqrt(jnp.maximum(jnp.sum(a * a, axis=-1, keepdims=True),
                                     jnp.float32(1e-24)))


# ------------------------------ tiling policy ------------------------------

# Double-buffered data budget kept v7x-safe (64 MiB physical VMEM); the scoped
# limit requested from the compiler is a bit above it for internal scratch.
_VMEM_DATA_BUDGET = 36 * 1024 * 1024
_VMEM_LIMIT_BYTES = 48 * 1024 * 1024
_TN_CANDIDATES = (2048, 1024, 512, 256, 128)
_TM_RESERVE = 512   # rows reserved for the B tile when choosing TN at init


def _tile_bytes(tm, tn, D):
    """Approx. double-buffered VMEM footprint of one grid step's tiles."""
    x_b = tm * D * 2            # bf16 x tile
    w_b = D * tn * 2            # bf16 W^T tile
    o_b = tm * tn * 4           # f32 output tile
    inv_b = 8 * tn * 4          # (1, tn) f32 inv-norm (sublane-padded to 8)
    lab_b = tm * 128 * 4        # (tm, 1) int32 labels (lane-padded to 128)
    return 2 * (x_b + w_b + o_b + inv_b + lab_b)


def _pick_tn(C, D, *, budget=_VMEM_DATA_BUDGET, tm_reserve=_TM_RESERVE):
    """Choose the class-tile width once per weight shape (at init)."""
    c128 = _round_up(C, 128)
    # Per-grid-step overhead (~0.35 us) expressed in "equivalent W columns"
    # (one column of W^T costs ~2*D bytes of HBM at ~1 TB/s).
    step_overhead_cols = max(128, int(0.35e-6 * 1.0e12 / (2.0 * max(D, 1))))
    best_tn, best_cost = 128, None
    for cand in _TN_CANDIDATES:
        tn = min(cand, c128)
        if _tile_bytes(tm_reserve, tn, D) > budget:
            continue
        n_steps = pl.cdiv(C, tn)
        # padded W traffic (columns) + per-step overhead; prefer larger tn on ties
        cost = n_steps * tn + n_steps * step_overhead_cols
        if best_cost is None or cost < best_cost:
            best_tn, best_cost = tn, cost
    return best_tn


def _pick_tm(B, D, tn, *, budget=_VMEM_DATA_BUDGET):
    """Largest batch tile (multiple of 16, <=1024) that fits the VMEM budget.

    A single B tile means W^T is streamed from HBM exactly once per call.
    """
    tm = min(_round_up(B, 16), 1024)
    while tm > 16 and _tile_bytes(tm, tn, D) > budget:
        tm = max(16, _round_up(tm // 2, 16))
    return tm
    # TODO(synk): for extreme D (block does not fit even at tm=16/tn=128) a
    # K-reduction grid axis with an f32 accumulator scratch would be needed.


# ------------------------------ weight prep --------------------------------

def _prep_weight(weight, tn):
    """One-time prep: W[C,D] -> (bf16 W^T[D,Cp], f32 1/||w_c|| [1,Cp])."""
    C, D = weight.shape
    Cp = _round_up(C, tn)
    w32 = weight.astype(jnp.float32)
    w_inv = lax.rsqrt(jnp.maximum(jnp.sum(w32 * w32, axis=-1), jnp.float32(1e-24)))
    wnt = w32.T.astype(jnp.bfloat16)              # [D, C], non-transposed MXU RHS
    if Cp != C:
        wnt = jnp.pad(wnt, ((0, 0), (0, Cp - C)))
        w_inv = jnp.pad(w_inv, (0, Cp - C))
    return wnt, w_inv.reshape(1, Cp)


# --------------------------------- kernel ----------------------------------

def _arc_margin_kernel(label_ref, xn_ref, wnt_ref, winv_ref, o_ref, *,
                       s, cos_m, sin_m, th, mm, easy_margin, c_hot, c_bg, tn):
    j = pl.program_id(1)

    # raw = normalize(x) @ W^T for this (TM, TN) tile; W columns are still
    # un-normalized (the per-column 1/||w|| is applied right after — exact).
    raw = lax.dot_general(
        xn_ref[...], wnt_ref[...],
        dimension_numbers=(((1,), (0,)), ((), ())),
        preferred_element_type=jnp.float32)
    cosine = raw * winv_ref[...]                   # broadcast (1, TN) over rows

    # delta = phi - cosine with the margin branch folded in; clamp the sqrt
    # argument so bf16 rounding that pushes |cosine| above 1 cannot NaN.
    sine = jnp.sqrt(jnp.clip(1.0 - cosine * cosine, 0.0, 1.0))
    delta_margin = cosine * jnp.float32(cos_m - 1.0) - sine * jnp.float32(sin_m)
    if easy_margin:
        delta = jnp.where(cosine > 0.0, delta_margin, jnp.float32(0.0))
    else:
        delta = jnp.where(cosine > jnp.float32(th), delta_margin, jnp.float32(-mm))

    # One-hot (scatter_ equivalent) via global column index compare; the column
    # iota is offset by this C tile's start.  Label smoothing and the *s scale
    # are folded into the two scalars c_hot / c_bg.
    tm_, tn_ = cosine.shape
    cols = lax.broadcasted_iota(jnp.int32, (tm_, tn_), 1) + j * tn
    hot = cols == label_ref[...]

    o_ref[...] = (jnp.float32(s) * cosine
                  + jnp.where(hot, jnp.float32(c_hot), jnp.float32(c_bg)) * delta
                  ).astype(o_ref.dtype)


# -------------------------------- wrapper -----------------------------------

def arc_margin_forward(x, label, wnt, w_inv, *, out_features, s, m,
                       easy_margin, ls_eps, tn, tm=None):
    """x: [B, D] f32, label: [B] int, wnt: [D, Cp] bf16, w_inv: [1, Cp] f32."""
    B, D = x.shape
    Dw, Cp = wnt.shape
    assert D == Dw, "prepared weight must be [in_features, padded_out_features]"
    assert Cp % tn == 0

    cos_m, sin_m = math.cos(m), math.sin(m)
    th, mm = math.cos(math.pi - m), math.sin(math.pi - m) * m
    # out = s*cosine + (hot ? c_hot : c_bg) * (phi - cosine)
    c_hot = float(s) * (1.0 - ls_eps + ls_eps / out_features)
    c_bg = float(s) * (ls_eps / out_features)

    tm = _pick_tm(B, D, tn) if tm is None else int(tm)
    Bp = _round_up(B, tm)

    # Hoisted x normalization (O(B*D), tiny next to the O(B*C*D) matmul).
    xn = _l2_normalize_rows(x.astype(jnp.float32)).astype(jnp.bfloat16)
    label2d = label.reshape(B, 1).astype(jnp.int32)
    if Bp != B:   # cheap pads over the small per-batch arrays only
        xn = jnp.pad(xn, ((0, Bp - B), (0, 0)))
        label2d = jnp.pad(label2d, ((0, Bp - B), (0, 0)), constant_values=-1)

    n_btiles, n_ctiles = Bp // tm, Cp // tn

    kernel = functools.partial(
        _arc_margin_kernel,
        s=float(s), cos_m=cos_m, sin_m=sin_m, th=th, mm=mm,
        easy_margin=bool(easy_margin), c_hot=c_hot, c_bg=c_bg, tn=tn)

    cost = pl.CostEstimate(
        flops=int(2 * Bp * Cp * D),
        transcendentals=int(Bp * Cp),                       # sqrt per logit
        bytes_accessed=int(Cp * D * 2 * n_btiles            # W^T, once per B tile
                           + Bp * D * 2                     # bf16 x
                           + Bp * Cp * 4                    # f32 logits
                           + Cp * 4 * n_btiles + Bp * 4))   # inv-norm + labels

    out = pl.pallas_call(
        kernel,
        out_shape=jax.ShapeDtypeStruct((Bp, Cp), jnp.float32),
        grid=(n_btiles, n_ctiles),       # C innermost -> x tile reused across C
        in_specs=[
            pl.BlockSpec((tm, 1), lambda i, j: (i, 0)),   # labels (int32)
            pl.BlockSpec((tm, D), lambda i, j: (i, 0)),   # normalized x (bf16)
            pl.BlockSpec((D, tn), lambda i, j: (0, j)),   # raw W^T (bf16)
            pl.BlockSpec((1, tn), lambda i, j: (0, j)),   # per-class 1/||w|| (f32)
        ],
        out_specs=pl.BlockSpec((tm, tn), lambda i, j: (i, j)),
        compiler_params=pltpu.CompilerParams(
            dimension_semantics=("parallel", "parallel"),
            vmem_limit_bytes=_VMEM_LIMIT_BYTES),
        cost_estimate=cost,
    )(label2d, xn, wnt, w_inv)

    return out[:B, :out_features]


def arc_margin_apply(x, weight, label, *, s, m, easy_margin, ls_eps,
                     tm=None, tn=None):
    """Convenience path that preps W on the fly (tests / one-off calls)."""
    C, D = weight.shape
    tn = _pick_tn(C, D) if tn is None else int(tn)
    wnt, w_inv = _prep_weight(weight, tn)
    return arc_margin_forward(x, label, wnt, w_inv, out_features=C, s=s, m=m,
                              easy_margin=easy_margin, ls_eps=ls_eps,
                              tn=tn, tm=tm)


class ArcMarginProduct:
    """JAX/Pallas equivalent of the PyTorch ArcMarginProduct module."""

    def __init__(self, in_features, out_features, s, m, easy_margin, ls_eps, key):
        self.in_features = in_features
        self.out_features = out_features
        self.s = float(s)
        self.m = float(m)
        self.ls_eps = float(ls_eps)
        self.easy_margin = bool(easy_margin)
        self.cos_m = math.cos(m)
        self.sin_m = math.sin(m)
        self.th = math.cos(math.pi - m)
        self.mm = math.sin(math.pi - m) * m

        # nn.init.xavier_uniform_ on (out_features, in_features):
        # bound = sqrt(6 / (fan_in + fan_out))
        bound = math.sqrt(6.0 / (in_features + out_features))
        self.weight = jax.random.uniform(
            key, (out_features, in_features), dtype=jnp.float32,
            minval=-bound, maxval=bound)

        # One-time weight prep: no per-step pass over the C x D array remains.
        self.tn = _pick_tn(out_features, in_features)
        self._wnt, self._w_inv = _prep_weight(self.weight, self.tn)

        self._fwd = jax.jit(functools.partial(
            arc_margin_forward, out_features=out_features, s=self.s, m=self.m,
            easy_margin=self.easy_margin, ls_eps=self.ls_eps, tn=self.tn))

    def __call__(self, x, label):
        return self._fwd(x, label, self._wnt, self._w_inv)


# ------------------------------- reference ----------------------------------

def _reference(x, weight, label, *, s, m, easy_margin, ls_eps, kernel_matched):
    """Pure-JAX reference mirroring the PyTorch forward.

    kernel_matched=True reproduces the kernel's numerics (bf16 operands,
    f32 accumulate, post-matmul per-class inv-norm); False is the f32 path.
    """
    x32 = x.astype(jnp.float32)
    w32 = weight.astype(jnp.float32)
    xn = _l2_normalize_rows(x32)
    if kernel_matched:
        w_inv = lax.rsqrt(jnp.maximum(jnp.sum(w32 * w32, axis=-1),
                                      jnp.float32(1e-24)))
        cosine = jnp.dot(xn.astype(jnp.bfloat16), w32.astype(jnp.bfloat16).T,
                         preferred_element_type=jnp.float32) * w_inv[None, :]
    else:
        cosine = jnp.dot(xn, _l2_normalize_rows(w32).T,
                         preferred_element_type=jnp.float32)
    sine = jnp.sqrt(jnp.clip(1.0 - cosine ** 2, 0.0, 1.0))
    phi = cosine * math.cos(m) - sine * math.sin(m)
    if easy_margin:
        phi = jnp.where(cosine > 0, phi, cosine)
    else:
        phi = jnp.where(cosine > math.cos(math.pi - m), phi,
                        cosine - math.sin(math.pi - m) * m)
    C = weight.shape[0]
    one_hot = jax.nn.one_hot(label, C, dtype=jnp.float32)
    if ls_eps > 0:
        one_hot = (1.0 - ls_eps) * one_hot + ls_eps / C
    return (one_hot * phi + (1.0 - one_hot) * cosine) * s


# --------------------------------- tests ------------------------------------

if __name__ == "__main__":
    key = jax.random.PRNGKey(0)

    def run_case(idx, B, D, C, s, m, easy_margin, ls_eps, tm=None, tn=None):
        kw, kx, kl = jax.random.split(jax.random.fold_in(key, idx), 3)
        module = ArcMarginProduct(D, C, s, m, easy_margin, ls_eps, kw)
        x = jax.random.normal(kx, (B, D), dtype=jnp.float32)
        label = jax.random.randint(kl, (B,), 0, C, dtype=jnp.int32)

        if tm is None and tn is None:
            out = module(x, label)                       # init-prepped W path
        else:                                            # forced multi-tile grid
            out = arc_margin_apply(x, module.weight, label, s=s, m=m,
                                   easy_margin=easy_margin, ls_eps=ls_eps,
                                   tm=tm, tn=tn)
        out = jax.block_until_ready(out)
        assert out.shape == (B, C)

        ref_matched = _reference(x, module.weight, label, s=s, m=m,
                                 easy_margin=easy_margin, ls_eps=ls_eps,
                                 kernel_matched=True)
        ref_f32 = _reference(x, module.weight, label, s=s, m=m,
                             easy_margin=easy_margin, ls_eps=ls_eps,
                             kernel_matched=False)
        assert jnp.allclose(out, ref_matched, atol=2e-2, rtol=1e-3), \
            f"case {idx}: mismatch vs bf16-matched reference"
        # Intentional precision tradeoff: bf16 operands -> ~0.1-0.3 abs error
        # in the s=30-scaled logits vs the pure-f32 path.
        assert jnp.allclose(out, ref_f32, atol=0.6), \
            f"case {idx}: mismatch vs f32 reference"

    # Default picker (tn=1024, tm=32): single-tile grid, ls_eps branch.
    run_case(0, B=32, D=128, C=1024, s=30.0, m=0.5, easy_margin=False, ls_eps=0.1)
    # Forced small tiles: grid (2, 8) exercises both grid axes, the one-hot
    # column offset, easy_margin and ls_eps=0.
    run_case(1, B=32, D=128, C=1024, s=30.0, m=0.5, easy_margin=True, ls_eps=0.0,
             tm=16, tn=128)
    # Ragged shapes: B/C padding + output slicing, non-128-multiple D.
    run_case(2, B=10, D=96, C=200, s=30.0, m=0.3, easy_margin=False, ls_eps=0.05)
    # Default picker with multiple C tiles (tn=2048 -> grid (1, 2)).
    run_case(3, B=48, D=64, C=4096, s=30.0, m=0.5, easy_margin=False, ls_eps=0.1)

    print("KERNEL_OK")
</pallas_src>

<mosaic_0001>
module attributes {stable_mosaic.version = 11 : i64} {
  func.func @_arc_margin_kernel(%arg0: i32, %arg1: i32, %arg2: memref<32x1xi32, #tpu.memory_space<vmem>>, %arg3: memref<32x128xbf16, #tpu.memory_space<vmem>>, %arg4: memref<128x1024xbf16, #tpu.memory_space<vmem>>, %arg5: memref<1x1024xf32, #tpu.memory_space<vmem>>, %arg6: memref<32x1024xf32, #tpu.memory_space<vmem>>) attributes {dimension_semantics = [#tpu.dimension_semantics<parallel>, #tpu.dimension_semantics<parallel>], iteration_bounds = array<i64: 1, 1>, scalar_prefetch = 0 : i64, scratch_operands = 0 : i64, tpu.core_type = #tpu.core_type<tc>, window_params = [{transform_indices = @transform_0, window_bounds = array<i64: 32, 1>}, {transform_indices = @transform_1, window_bounds = array<i64: 32, 128>}, {transform_indices = @transform_2, window_bounds = array<i64: 128, 1024>}, {transform_indices = @transform_3, window_bounds = array<i64: 1, 1024>}, {transform_indices = @transform_4, window_bounds = array<i64: 32, 1024>}]} {
    %c0 = arith.constant 0 : index
    %c0_0 = arith.constant 0 : index
    %0 = vector.load %arg3[%c0, %c0_0] : memref<32x128xbf16, #tpu.memory_space<vmem>>, vector<32x128xbf16>
    %c0_1 = arith.constant 0 : index
    %c0_2 = arith.constant 0 : index
    %1 = vector.load %arg4[%c0_1, %c0_2] : memref<128x1024xbf16, #tpu.memory_space<vmem>>, vector<128x1024xbf16>
    %cst = arith.constant dense<0.000000e+00> : vector<32x1024xf32>
    %2 = tpu.matmul %0, %1, %cst {dimension_numbers = #tpu.dot_dimension_numbers<[1], [0], [0], [1], [0, 0, 1, 1], [], []>} : vector<32x128xbf16>, vector<128x1024xbf16>, vector<32x1024xf32> -> vector<32x1024xf32>
    %c0_3 = arith.constant 0 : index
    %c0_4 = arith.constant 0 : index
    %3 = vector.load %arg5[%c0_3, %c0_4] : memref<1x1024xf32, #tpu.memory_space<vmem>>, vector<1x1024xf32>
    %4 = vector.broadcast %3 : vector<1x1024xf32> to vector<32x1024xf32>
    %5 = arith.mulf %2, %4 : vector<32x1024xf32>
    %6 = arith.mulf %5, %5 : vector<32x1024xf32>
    %cst_5 = arith.constant 1.000000e+00 : f32
    %7 = vector.broadcast %cst_5 : f32 to vector<32x1024xf32>
    %8 = arith.subf %7, %6 : vector<32x1024xf32>
    %cst_6 = arith.constant 0.000000e+00 : f32
    %cst_7 = arith.constant 1.000000e+00 : f32
    %9 = vector.broadcast %cst_6 : f32 to vector<32x1024xf32>
    %10 = arith.maximumf %9, %8 : vector<32x1024xf32>
    %11 = vector.broadcast %cst_7 : f32 to vector<32x1024xf32>
    %12 = arith.minimumf %11, %10 : vector<32x1024xf32>
    %13 = math.sqrt %12 : vector<32x1024xf32>
    %cst_8 = arith.constant -0.122417435 : f32
    %14 = vector.broadcast %cst_8 : f32 to vector<32x1024xf32>
    %15 = arith.mulf %5, %14 : vector<32x1024xf32>
    %cst_9 = arith.constant 0.47942555 : f32
    %16 = vector.broadcast %cst_9 : f32 to vector<32x1024xf32>
    %17 = arith.mulf %13, %16 : vector<32x1024xf32>
    %18 = arith.subf %15, %17 : vector<32x1024xf32>
    %cst_10 = arith.constant -0.87758255 : f32
    %19 = vector.broadcast %cst_10 : f32 to vector<32x1024xf32>
    %20 = arith.cmpf ogt, %5, %19 : vector<32x1024xf32>
    %cst_11 = arith.constant -0.239712775 : f32
    %21 = vector.broadcast %cst_11 : f32 to vector<32x1024xf32>
    %22 = arith.select %20, %18, %21 : vector<32x1024xi1>, vector<32x1024xf32>
    %23 = tpu.iota {dimensions = array<i32: 1>} : vector<32x1024xi32>
    %c1024_i32 = arith.constant 1024 : i32
    %24 = arith.muli %arg1, %c1024_i32 : i32
    %25 = vector.broadcast %24 : i32 to vector<32x1024xi32>
    %26 = arith.addi %23, %25 : vector<32x1024xi32>
    %c0_12 = arith.constant 0 : index
    %c0_13 = arith.constant 0 : index
    %27 = vector.load %arg2[%c0_12, %c0_13] : memref<32x1xi32, #tpu.memory_space<vmem>>, vector<32x1xi32>
    %28 = vector.broadcast %27 : vector<32x1xi32> to vector<32x1024xi32>
    %29 = arith.cmpi eq, %26, %28 : vector<32x1024xi32>
    %cst_14 = arith.constant 3.000000e+01 : f32
    %30 = vector.broadcast %cst_14 : f32 to vector<32x1024xf32>
    %31 = arith.mulf %30, %5 : vector<32x1024xf32>
    %cst_15 = arith.constant 27.0029297 : f32
    %cst_16 = arith.constant 0.0029296875 : f32
    %32 = vector.broadcast %cst_15 : f32 to vector<32x1024xf32>
    %33 = vector.broadcast %cst_16 : f32 to vector<32x1024xf32>
    %34 = arith.select %29, %32, %33 : vector<32x1024xi1>, vector<32x1024xf32>
    %35 = arith.mulf %34, %22 : vector<32x1024xf32>
    %36 = arith.addf %31, %35 : vector<32x1024xf32>
    %c0_17 = arith.constant 0 : index
    %c0_18 = arith.constant 0 : index
    %37 = vector.load %arg6[%c0_17, %c0_18] : memref<32x1024xf32, #tpu.memory_space<vmem>>, vector<32x1024xf32>
    tpu.vector_store %arg6[%c0_17, %c0_18], %36 {strides = array<i32>} : memref<32x1024xf32, #tpu.memory_space<vmem>>, vector<32x1024xf32>,
    return
  }
  func.func @transform_0(%arg0: i32, %arg1: i32) -> (i32, i32) {
    %c0_i32 = arith.constant 0 : i32
    %c0_i32_0 = arith.constant 0 : i32
    return %arg0, %c0_i32 : i32, i32
  }
  func.func @transform_1(%arg0: i32, %arg1: i32) -> (i32, i32) {
    %c0_i32 = arith.constant 0 : i32
    %c0_i32_0 = arith.constant 0 : i32
    return %arg0, %c0_i32 : i32, i32
  }
  func.func @transform_2(%arg0: i32, %arg1: i32) -> (i32, i32) {
    %c0_i32 = arith.constant 0 : i32
    %c0_i32_0 = arith.constant 0 : i32
    return %c0_i32, %arg1 : i32, i32
  }
  func.func @transform_3(%arg0: i32, %arg1: i32) -> (i32, i32) {
    %c0_i32 = arith.constant 0 : i32
    %c0_i32_0 = arith.constant 0 : i32
    return %c0_i32, %arg1 : i32, i32
  }
  func.func @transform_4(%arg0: i32, %arg1: i32) -> (i32, i32) {
    %c0_i32 = arith.constant 0 : i32
    return %arg0, %arg1 : i32, i32
  }
}

</mosaic_0001>

<bundles_post_ra>
// kernel: arc_margin_forward.1
= control target key start
LH: loop header
LB: loop body
LE: loop exit
PB: predicated region body
PF: predicated region fallthrough
CT: control target
= control target key end

     0   :  { %9 = vsyncpa [#allocation3], 0  ;;  %s2849_s0 = inlined_call_operand.vmem [shape: s32[32,1], index: 0, kind: input, shape index: {}]   ;;  %s2850_s1 = inlined_call_operand.vmem [shape: bf16[32,128], index: 1, kind: input, shape index: {}]   ;;  %s2851_s2 = inlined_call_operand.hbm [shape: bf16[128,1024], index: 2, kind: input, shape index: {}]   ;;  %s2852_s3 = inlined_call_operand.vmem [shape: f32[1,1024], index: 3, kind: input, shape index: {}]   ;;  %s2853_s4 = inlined_call_operand.hbm [shape: f32[32,1024], index: 4, kind: output, shape index: {}]  }
   0x1   :  { %10 = vsyncpa [#allocation4], 0  ;;  %s1665_s15 = smov [#allocation2]   ;;  %s1617_s19 = scalar_lea.hbm %s2851_s2, 8192 }
   0x2   :  { %s20_s16 = sshll.u32 %s1665_s15, 4  ;;  %p1618_p0 = scmp.ne.s32.totalorder %s2851_s2, %s1617_s19  ;;  %s21_s16 = int_to_ptr.vmem [resolvable:$true] %s20_s16 }
   0x3   :  { %p1621_p1 = scmp.lt.u32.totalorder %s1617_s19, %s2851_s2 }
   0x5   :  { %p1623_p2 = pnand %p1621_p1, %p1618_p0 }
   0x7   :  { %1626 = shalt.err (!%p1623_p2)
}
   0x8   :  { %s1627_s24 = scalar_lea.vmem %s21_s16, 8192  ;;  %p1632_p4 = scmp.lt.s32.totalorder %s21_s16, %s21_s16 }
   0x9   :  { %p1628_p3 = scmp.ne.s32.totalorder %s21_s16, %s1627_s24  ;;  %p1633_p5 = scmp.lt.s32.totalorder %s1627_s24, %s1627_s24 }
   0xb   :  { %p1634_p6 = por %p1633_p5, %p1632_p4 }
   0xd   :  { %p1635_p7 = pnand %p1634_p6, %p1628_p3 }
   0xf   :  { %1638 = shalt.err (!%p1635_p7)
}
  0x10   :  { %s1666_s25 = smov 512   ;;  %s1667_s26 = smov 32  }
  0x11   :  { %26 = dma.hbm_to_vmem [thread:$0]  %s2851_s2, 8192, %s21_s16, [#allocation3], %s1666_s25, %s1666_s25, %s1667_s26  }
  0x12   :  { %1661 = dma.done.wait [#allocation3], 8192  }
  0x13   :  { %1662 = vsyncadd [#allocation3], 4294959104  ;;  %v1668_v0 = vmov 0   ;;  %v37_v1 = vld [vmem:[#allocation2] sm:$0xff]  ;;  %v38_v3 = vld [vmem:[#allocation2 + $0x8] sm:$0xff] }
  0x14   :  { %465 = vmatprep.mubr.bf16.mxu0 %v1668_v0  ;;  %518 = vmatprep.mubr.bf16.mxu1 %v1668_v0  ;;  %v41_v2 = vld [vmem:[#allocation2 + $0x20] sm:$0xff]  ;;  %v42_v5 = vld [vmem:[#allocation2 + $0x28] sm:$0xff]  ;;  %v1252_v61 = vld [vmem:[%s2849_s0 + $0x10] sm:$0xff] }
  0x15   :  { %1549 = vset.pattern.permute.xlu0 %v1668_v0  ;;  %1550 = vset.pattern.permute.xlu1 %v1668_v0  ;;  %v1478_v4 = vcombine.high %v37_v1, %v41_v2  ;;  %v1477_v6 = vcombine.low %v37_v1, %v41_v2  ;;  %v45_v7 = vld [vmem:[#allocation2 + $0x40] sm:$0xff]  ;;  %v1480_v9 = vcombine.high %v38_v3, %v42_v5  ;;  %v46_v12 = vld [vmem:[#allocation2 + $0x48] sm:$0xff] }
  0x16   :  { %v49_v8 = vld [vmem:[#allocation2 + $0x60] sm:$0xff]  ;;  %v1479_v10 = vcombine.low %v38_v3, %v42_v5  ;;  %v50_v13 = vld [vmem:[#allocation2 + $0x68] sm:$0xff]  ;;  %v39_v3 = vld [vmem:[#allocation2 + $0x10] sm:$0xff]  ;;  %1261 = vperm.xlu1 %1550, %v1252_v61  }
  0x17   :  { %v1486_v11 = vcombine.high %v45_v7, %v49_v8  ;;  %v53_v14 = vld [vmem:[#allocation2 + $0x80] sm:$0xff]  ;;  %433 = vmatprep.subr.bf16.mxu0 %v1478_v4  ;;  %v1488_v15 = vcombine.high %v46_v12, %v50_v13  ;;  %v54_v17 = vld [vmem:[#allocation2 + $0x88] sm:$0xff]  ;;  %486 = vmatprep.subr.bf16.mxu1 %v1480_v9  ;;  %v1485_v19 = vcombine.low %v45_v7, %v49_v8  ;;  %v43_v4 = vld [vmem:[#allocation2 + $0x30] sm:$0xff] }
  0x18   :  { %v57_v16 = vld [vmem:[#allocation2 + $0xa0] sm:$0xff]  ;;  %v58_v18 = vld [vmem:[#allocation2 + $0xa8] sm:$0xff]  ;;  %434 = vmatpush1.bf16.msra.mxu0 %v1477_v6  ;;  %487 = vmatpush1.bf16.msra.mxu1 %v1479_v10  ;;  %v1487_v20 = vcombine.low %v46_v12, %v50_v13  ;;  %v40_v5 = vld [vmem:[#allocation2 + $0x18] sm:$0xff]  ;;  %v1482_v10 = vcombine.high %v39_v3, %v43_v4 }
  0x19   :  { %435 = vmatprep.subr.bf16.mxu0 %v1486_v11  ;;  %v1494_v21 = vcombine.high %v53_v14, %v57_v16  ;;  %488 = vmatprep.subr.bf16.mxu1 %v1488_v15  ;;  %v1496_v22 = vcombine.high %v54_v17, %v58_v18  ;;  %v61_v23 = vld [vmem:[#allocation2 + $0xc0] sm:$0xff]  ;;  %v62_v25 = vld [vmem:[#allocation2 + $0xc8] sm:$0xff]  ;;  %v1493_v27 = vcombine.low %v53_v14, %v57_v16  ;;  %v44_v6 = vld [vmem:[#allocation2 + $0x38] sm:$0xff] }
  0x1a   :  { %v65_v24 = vld [vmem:[#allocation2 + $0xe0] sm:$0xff]  ;;  %v66_v26 = vld [vmem:[#allocation2 + $0xe8] sm:$0xff]  ;;  %v1495_v28 = vcombine.low %v54_v17, %v58_v18  ;;  %v1253_v7 = vld [vmem:[%s2849_s0 + $0x18] sm:$0xff]  ;;  %v1484_v11 = vcombine.high %v40_v5, %v44_v6  ;;  %v1481_v17 = vcombine.low %v39_v3, %v43_v4  ;;  %v1483_v18 = vcombine.low %v40_v5, %v44_v6 }
  0x1b   :  { %v1502_v29 = vcombine.high %v61_v23, %v65_v24  ;;  %v1504_v30 = vcombine.high %v62_v25, %v66_v26  ;;  %v69_v31 = vld [vmem:[#allocation2 + $0x100] sm:$0xff]  ;;  %v70_v33 = vld [vmem:[#allocation2 + $0x108] sm:$0xff]  ;;  %v1501_v35 = vcombine.low %v61_v23, %v65_v24  ;;  %v1503_v36 = vcombine.low %v62_v25, %v66_v26  ;;  %v47_v12 = vld [vmem:[#allocation2 + $0x50] sm:$0xff]  ;;  %1264 = vperm.xlu1 %1550, %v1253_v7  }
  0x1c   :  { %436 = vmatpush1.bf16.msra.mxu0 %v1485_v19  ;;  %489 = vmatpush1.bf16.msra.mxu1 %v1487_v20  ;;  %v73_v32 = vld [vmem:[#allocation2 + $0x120] sm:$0xff]  ;;  %v74_v34 = vld [vmem:[#allocation2 + $0x128] sm:$0xff]  ;;  %v51_v13 = vld [vmem:[#allocation2 + $0x70] sm:$0xff] }
  0x1d   :  { %437 = vmatprep.subr.bf16.mxu0 %v1494_v21  ;;  %490 = vmatprep.subr.bf16.mxu1 %v1496_v22  ;;  %v1510_v37 = vcombine.high %v69_v31, %v73_v32  ;;  %v77_v38 = vld [vmem:[#allocation2 + $0x140] sm:$0xff]  ;;  %v1512_v39 = vcombine.high %v70_v33, %v74_v34  ;;  %v78_v41 = vld [vmem:[#allocation2 + $0x148] sm:$0xff]  ;;  %v1509_v43 = vcombine.low %v69_v31, %v73_v32  ;;  %v48_v15 = vld [vmem:[#allocation2 + $0x58] sm:$0xff] }
  0x1e   :  { %v81_v40 = vld [vmem:[#allocation2 + $0x160] sm:$0xff]  ;;  %v82_v42 = vld [vmem:[#allocation2 + $0x168] sm:$0xff]  ;;  %v1511_v44 = vcombine.low %v70_v33, %v74_v34  ;;  %v52_v16 = vld [vmem:[#allocation2 + $0x78] sm:$0xff]  ;;  %v1490_v19 = vcombine.high %v47_v12, %v51_v13  ;;  %v1489_v25 = vcombine.low %v47_v12, %v51_v13 }
  0x1f   :  { %v1518_v45 = vcombine.high %v77_v38, %v81_v40  ;;  %v1520_v46 = vcombine.high %v78_v41, %v82_v42  ;;  %v85_v47 = vld [vmem:[#allocation2 + $0x180] sm:$0xff]  ;;  %v86_v49 = vld [vmem:[#allocation2 + $0x188] sm:$0xff]  ;;  %v1517_v51 = vcombine.low %v77_v38, %v81_v40  ;;  %v1519_v52 = vcombine.low %v78_v41, %v82_v42  ;;  %v55_v21 = vld [vmem:[#allocation2 + $0x90] sm:$0xff] }
  0x20   :  { %438 = vmatpush1.bf16.msra.mxu0 %v1493_v27  ;;  %491 = vmatpush1.bf16.msra.mxu1 %v1495_v28  ;;  %v89_v48 = vld [vmem:[#allocation2 + $0x1a0] sm:$0xff]  ;;  %v90_v50 = vld [vmem:[#allocation2 + $0x1a8] sm:$0xff]  ;;  %v1492_v20 = vcombine.high %v48_v15, %v52_v16  ;;  %v59_v22 = vld [vmem:[#allocation2 + $0xb0] sm:$0xff]  ;;  %v1491_v26 = vcombine.low %v48_v15, %v52_v16 }
  0x21   :  { %439 = vmatprep.subr.bf16.mxu0 %v1502_v29  ;;  %492 = vmatprep.subr.bf16.mxu1 %v1504_v30  ;;  %v1526_v53 = vcombine.high %v85_v47, %v89_v48  ;;  %v1528_v54 = vcombine.high %v86_v49, %v90_v50  ;;  %v93_v55 = vld [vmem:[#allocation2 + $0x1c0] sm:$0xff]  ;;  %v94_v57 = vld [vmem:[#allocation2 + $0x1c8] sm:$0xff]  ;;  %v1525_v60 = vcombine.low %v85_v47, %v89_v48  ;;  %v56_v23 = vld [vmem:[#allocation2 + $0x98] sm:$0xff] }
  0x22   :  { %v97_v56 = vld [vmem:[#allocation2 + $0x1e0] sm:$0xff]  ;;  %v98_v58 = vld [vmem:[#allocation2 + $0x1e8] sm:$0xff]  ;;  %v1527_v62 = vcombine.low %v86_v49, %v90_v50  ;;  %v60_v24 = vld [vmem:[#allocation2 + $0xb8] sm:$0xff]  ;;  %v1498_v27 = vcombine.high %v55_v21, %v59_v22  ;;  %v1497_v34 = vcombine.low %v55_v21, %v59_v22 }
  0x23   :  { %v1250_v59 = vld [vmem:[%s2849_s0] sm:$0xff]  ;;  %v1534_v63 = vcombine.high %v93_v55, %v97_v56  ;;  %v1251_v1 = vld [vmem:[%s2849_s0 + $0x8] sm:$0xff]  ;;  %v1536_v2 = vcombine.high %v94_v57, %v98_v58  ;;  %v1533_v8 = vcombine.low %v93_v55, %v97_v56  ;;  %v1535_v9 = vcombine.low %v94_v57, %v98_v58  ;;  %v63_v29 = vld [vmem:[#allocation2 + $0xd0] sm:$0xff] }
  0x24   :  { %440 = vmatpush1.bf16.msra.mxu0 %v1501_v35  ;;  %493 = vmatpush1.bf16.msra.mxu1 %v1503_v36  ;;  %v1729_v14 = vld [vmem:[%s2850_s1] sm:$0xff]   ;;  %v1500_v28 = vcombine.high %v56_v23, %v60_v24  ;;  %v67_v30 = vld [vmem:[#allocation2 + $0xf0] sm:$0xff]  ;;  %v1738_v31 = vld [vmem:[%s2850_s1 + $0x8] sm:$0xff]   ;;  %v1499_v35 = vcombine.low %v56_v23, %v60_v24  ;;  %v2867_v24 = vmov 0.0029296875  }
  0x25   :  { %441 = vmatprep.subr.bf16.mxu0 %v1510_v37  ;;  %494 = vmatprep.subr.bf16.mxu1 %v1512_v39  ;;  %v64_v32 = vld [vmem:[#allocation2 + $0xd8] sm:$0xff]  ;;  %v1506_v36 = vcombine.high %v63_v29, %v67_v30  ;;  %v71_v38 = vld [vmem:[#allocation2 + $0x110] sm:$0xff]  ;;  %v1505_v42 = vcombine.low %v63_v29, %v67_v30  ;;  %v1767_v16 = vld [vmem:[%s2852_s3] sm:$0xff]  ;;  %s1670_s3 = smov [#allocation5]  }
  0x26   :  { %1255 = vperm.xlu0 %1549, %v1250_v59   ;;  %v68_v33 = vld [vmem:[#allocation2 + $0xf8] sm:$0xff]  ;;  %v75_v39 = vld [vmem:[#allocation2 + $0x130] sm:$0xff]  ;;  %s1463_s14 = sshll.u32 %s1670_s3, 4  ;;  %s1464_s14 = int_to_ptr.vmem [resolvable:$true] %s1463_s14 }
  0x27   :  { %v1508_v37 = vcombine.high %v64_v32, %v68_v33  ;;  %v72_v40 = vld [vmem:[#allocation2 + $0x118] sm:$0xff]  ;;  %v83_v47 = vld [vmem:[#allocation2 + $0x170] sm:$0xff]  ;;  %v1513_v50 = vcombine.low %v71_v38, %v75_v39  ;;  %s1639_s15 = scalar_lea.vmem %s1464_s14, 4096  ;;  %p1644_p9 = scmp.lt.s32.totalorder %s1464_s14, %s1464_s14 }
  0x28   :  { %442 = vmatpush1.bf16.msra.mxu0 %v1509_v43  ;;  %495 = vmatpush1.bf16.msra.mxu1 %v1511_v44  ;;  %v76_v41 = vld [vmem:[#allocation2 + $0x138] sm:$0xff]  ;;  %v1507_v43 = vcombine.low %v64_v32, %v68_v33  ;;  %v1514_v44 = vcombine.high %v71_v38, %v75_v39  ;;  %v91_v55 = vld [vmem:[#allocation2 + $0x1b0] sm:$0xff]  ;;  %p1640_p8 = scmp.ne.s32.totalorder %s1464_s14, %s1639_s15  ;;  %p1645_p10 = scmp.lt.s32.totalorder %s1639_s15, %s1639_s15 }
  0x29   :  { %443 = vmatprep.subr.bf16.mxu0 %v1518_v45  ;;  %496 = vmatprep.subr.bf16.mxu1 %v1520_v46  ;;  %v1516_v45 = vcombine.high %v72_v40, %v76_v41  ;;  %v79_v46 = vld [vmem:[#allocation2 + $0x150] sm:$0xff]  ;;  %v80_v48 = vld [vmem:[#allocation2 + $0x158] sm:$0xff] }
  0x2a   :  { %1258 = vperm.xlu0 %1549, %v1251_v1   ;;  %v84_v49 = vld [vmem:[#allocation2 + $0x178] sm:$0xff]  ;;  %v1521_v58 = vcombine.low %v79_v46, %v83_v47  ;;  %p1646_p11 = por %p1645_p10, %p1644_p9 }
  0x2b   :  { %v88_v56 = vld [vmem:[#allocation2 + $0x198] sm:$0xff]  ;;  %v1523_v59 = vcombine.low %v80_v48, %v84_v49 }
  0x2c   :  { %444 = vmatpush1.bf16.msra.mxu0 %v1517_v51  ;;  %497 = vmatpush1.bf16.msra.mxu1 %v1519_v52  ;;  %v1515_v51 = vcombine.low %v72_v40, %v76_v41  ;;  %v1522_v52 = vcombine.high %v79_v46, %v83_v47  ;;  %v92_v57 = vld [vmem:[#allocation2 + $0x1b8] sm:$0xff]  ;;  %p1647_p12 = pnand %p1646_p11, %p1640_p8 }
  0x2d   :  { %445 = vmatprep.subr.bf16.mxu0 %v1526_v53  ;;  %498 = vmatprep.subr.bf16.mxu1 %v1528_v54  ;;  %v1524_v53 = vcombine.high %v80_v48, %v84_v49  ;;  %v87_v54 = vld [vmem:[#allocation2 + $0x190] sm:$0xff]  ;;  %v1532_v61 = vcombine.high %v88_v56, %v92_v57  ;;  %v96_v1 = vld [vmem:[#allocation2 + $0x1d8] sm:$0xff]  ;;  %v1531_v4 = vcombine.low %v88_v56, %v92_v57 }
  0x2e   :  { %v1529_v3 = vcombine.low %v87_v54, %v91_v55 }
  0x30   :  { %446 = vmatpush1.bf16.msra.mxu0 %v1525_v60  ;;  %499 = vmatpush1.bf16.msra.mxu1 %v1527_v62  ;;  %v1530_v60 = vcombine.high %v87_v54, %v91_v55  ;;  %v95_v62 = vld [vmem:[#allocation2 + $0x1d0] sm:$0xff] }
  0x31   :  { %447 = vmatprep.subr.bf16.mxu0 %v1534_v63  ;;  %500 = vmatprep.subr.bf16.mxu1 %v1536_v2  ;;  %v99_v63 = vld [vmem:[#allocation2 + $0x1f0] sm:$0xff]  ;;  %v100_v2 = vld [vmem:[#allocation2 + $0x1f8] sm:$0xff] }
  0x32   :  { %v1538_v5 = vcombine.high %v95_v62, %v99_v63  ;;  %v1540_v6 = vcombine.high %v96_v1, %v100_v2  ;;  %v1537_v7 = vcombine.low %v95_v62, %v99_v63 }
  0x34   :  { %448 = vmatpush1.bf16.msra.mxu0 %v1533_v8  ;;  %501 = vmatpush1.bf16.msra.mxu1 %v1535_v9  ;;  %v1539_v8 = vcombine.low %v96_v1, %v100_v2  ;;  %v647_v9 = vlaneseq }
  0x35   :  { %539 = vmatprep.subr.bf16.mxu0 %v1482_v10  ;;  %592 = vmatprep.subr.bf16.mxu1 %v1484_v11 }
  0x36   :  { %v1750_v10 = vshrl.u32 %v647_v9, 7  ;;  %v1752_v11 = vand.u32 127, %v647_v9 }
  0x37   :  { %466 = vmatmul.mubr.bf16.vlgmr.msra.gmra.mrb[0].mxu0 %v1729_v14  ;;  %519 = vmatmul.mubr.bf16.vlgmr.msra.gmra.mrb[0].mxu1 %v1729_v14 }
  0x38   :  { %540 = vmatpush1.bf16.msra.mxu0 %v1481_v17  ;;  %593 = vmatpush1.bf16.msra.mxu1 %v1483_v18  ;;  %v649_v13 = vsub.s32 0, %v1750_v10  ;;  %v657_v15 = vsub.s32 2, %v1750_v10  ;;  %v653_v17 = vsub.s32 1, %v1750_v10  ;;  %v1771_v18 = vadd.s32 384, %v1752_v11 }
  0x39   :  { %541 = vmatprep.subr.bf16.mxu0 %v1490_v19  ;;  %594 = vmatprep.subr.bf16.mxu1 %v1492_v20  ;;  %v661_v23 = vsub.s32 3, %v1750_v10  ;;  %v673_v29 = vsub.s32 6, %v1750_v10  ;;  %v669_v33 = vsub.s32 5, %v1750_v10  ;;  %v1874_v57 = vadd.s32 512, %v1752_v11 }
  0x3a   :  { %475 = vmatprep.mubr.bf16.mxu0 %v1668_v0  ;;  %528 = vmatprep.mubr.bf16.mxu1 %v1668_v0  ;;  %v1778_v20 = vrot.slane %v1767_v16, %v649_v13  ;;  %v1781_v21 = vrot.slane %v1767_v16, %v657_v15  ;;  %v1788_v22 = vrot.slane %v1767_v16, %v653_v17  ;;  %v1888_v1 = vadd.s32 768, %v1752_v11 }
  0x3b   :  { %v1825_v38 = vrot.slane %v1767_v16, %v661_v23  ;;  %v1857_v49 = vrot.slane %v1767_v16, %v673_v29  ;;  %2880 = vst [vmem:[#allocation15_spill] sm:$0xff] %v1874_v57  ;;  %v1891_v2 = vadd.s32 640, %v1752_v11 }
  0x3c   :  { %542 = vmatpush1.bf16.msra.mxu0 %v1489_v25  ;;  %595 = vmatpush1.bf16.msra.mxu1 %v1491_v26  ;;  %v665_v26 = vsub.s32 4, %v1750_v10  ;;  %2882 = vst [vmem:[#allocation17_spill] sm:$0xff] %v1888_v1 }
  0x3d   :  { %543 = vmatprep.subr.bf16.mxu0 %v1498_v27  ;;  %596 = vmatprep.subr.bf16.mxu1 %v1500_v28  ;;  %2878 = vst [vmem:[#allocation13_spill] sm:$0xff] %v1857_v49  ;;  %2883 = vst [vmem:[#allocation18_spill] sm:$0xff] %v1891_v2 }
  0x3e   :  { %v1852_v46 = vrot.slane %v1767_v16, %v665_v26 }
  0x3f   :  { %476 = vmatmul.mubr.bf16.gmra.mrb[4].mxu0 %v1738_v31  ;;  %529 = vmatmul.mubr.bf16.gmra.mrb[4].mxu1 %v1738_v31 }
  0x40   :  { %544 = vmatpush1.bf16.msra.mxu0 %v1497_v34  ;;  %597 = vmatpush1.bf16.msra.mxu1 %v1499_v35  ;;  %2877 = vst [vmem:[#allocation12_spill] sm:$0xff] %v1852_v46 }
  0x41   :  { %545 = vmatprep.subr.bf16.mxu0 %v1506_v36  ;;  %598 = vmatprep.subr.bf16.mxu1 %v1508_v37 }
  0x42   :  { %571 = vmatprep.mubr.bf16.mxu0 %v1668_v0  ;;  %624 = vmatprep.mubr.bf16.mxu1 %v1668_v0 }
  0x44   :  { %546 = vmatpush1.bf16.msra.mxu0 %v1505_v42  ;;  %599 = vmatpush1.bf16.msra.mxu1 %v1507_v43 }
  0x45   :  { %547 = vmatprep.subr.bf16.mxu0 %v1514_v44  ;;  %600 = vmatprep.subr.bf16.mxu1 %v1516_v45 }
  0x48   :  { %548 = vmatpush1.bf16.msra.mxu0 %v1513_v50  ;;  %601 = vmatpush1.bf16.msra.mxu1 %v1515_v51 }
  0x49   :  { %549 = vmatprep.subr.bf16.mxu0 %v1522_v52  ;;  %602 = vmatprep.subr.bf16.mxu1 %v1524_v53  ;;  %v1865_v53 = vrot.slane %v1767_v16, %v669_v33 }
  0x4b   :  { %2879 = vst [vmem:[#allocation14_spill] sm:$0xff] %v1865_v53 }
  0x4c   :  { %550 = vmatpush1.bf16.msra.mxu0 %v1521_v58  ;;  %603 = vmatpush1.bf16.msra.mxu1 %v1523_v59 }
  0x4d   :  { %551 = vmatprep.subr.bf16.mxu0 %v1530_v60  ;;  %604 = vmatprep.subr.bf16.mxu1 %v1532_v61 }
  0x50   :  { %552 = vmatpush1.bf16.msra.mxu0 %v1529_v3  ;;  %605 = vmatpush1.bf16.msra.mxu1 %v1531_v4 }
  0x51   :  { %553 = vmatprep.subr.bf16.mxu0 %v1538_v5  ;;  %606 = vmatprep.subr.bf16.mxu1 %v1540_v6  ;;  %v1896_v6 = vadd.s32 896, %v1752_v11 }
  0x53   :  { %2884 = vst [vmem:[#allocation19_spill] sm:$0xff] %v1896_v6 }
  0x54   :  { %554 = vmatpush1.bf16.msra.mxu0 %v1537_v7  ;;  %607 = vmatpush1.bf16.msra.mxu1 %v1539_v8 }
  0x57   :  { %572 = vmatmul.mubr.bf16.vlgmr.msra.gmra.mrb[8].mxu0 %v1729_v14  ;;  %625 = vmatmul.mubr.bf16.vlgmr.msra.gmra.mrb[8].mxu1 %v1729_v14  ;;  %v1759_v14 = vadd.s32 128, %v1752_v11 }
  0x58   :  { %581 = vmatprep.mubr.bf16.mxu0 %v1668_v0  ;;  %634 = vmatprep.mubr.bf16.mxu1 %v1668_v0  ;;  %v1762_v0 = vadd.s32 256, %v1752_v11 }
  0x5f   :  { %582 = vmatmul.mubr.bf16.gmra.mrb[12].mxu0 %v1738_v31  ;;  %635 = vmatmul.mubr.bf16.gmra.mrb[12].mxu1 %v1738_v31 }
  0x95   :  { %v1819_v34 = vpop.permute.xlu1 %1261 }
  0x96   :  { %2874 = vst [vmem:[#allocation9_spill] sm:$0xff] %v1819_v34  ;;  %vm1282_vm8 = vcmp.eq.s32.totalorder %v1752_v11, %v1819_v34  ;;  %vm1283_vm9 = vcmp.eq.s32.totalorder %v1759_v14, %v1819_v34  ;;  %vm1284_vm10 = vcmp.eq.s32.totalorder %v1762_v0, %v1819_v34  ;;  %vm1285_vm11 = vcmp.eq.s32.totalorder %v1771_v18, %v1819_v34 }
  0x97   :  { %v1885_v61 = vsel %vm1282_vm8, 27.00293, %v2867_v24  ;;  %v1902_v7 = vsel %vm1284_vm10, 27.00293, %v2867_v24  ;;  %v1925_v33 = vsel %vm1283_vm9, 27.00293, %v2867_v24 }
  0x98   :  { %2881 = vst [vmem:[#allocation16_spill] sm:$0xff] %v1885_v61  ;;  %2885 = vst [vmem:[#allocation20_spill] sm:$0xff] %v1902_v7 }
  0x99   :  { %2887 = vst [vmem:[#allocation22_spill] sm:$0xff] %v1925_v33 }
  0x9a   :  { %v1904_v8 = vpop.permute.xlu1 %1264 }
  0x9b   :  { %2886 = vst [vmem:[#allocation21_spill] sm:$0xff] %v1904_v8 }
  0xa5   :  { %v1754_v12 = vpop.permute.xlu0 %1255 }
  0xa6   :  { %vm1266_vm0 = vcmp.eq.s32.totalorder %v1752_v11, %v1754_v12  ;;  %vm1267_vm1 = vcmp.eq.s32.totalorder %v1759_v14, %v1754_v12  ;;  %vm1268_vm2 = vcmp.eq.s32.totalorder %v1762_v0, %v1754_v12  ;;  %vm1269_vm3 = vcmp.eq.s32.totalorder %v1771_v18, %v1754_v12 }
  0xa7   :  { %v1796_v25 = vsel %vm1266_vm0, 27.00293, %v2867_v24  ;;  %v1804_v27 = vsel %vm1267_vm1, 27.00293, %v2867_v24  ;;  %v1807_v28 = vsel %vm1268_vm2, 27.00293, %v2867_v24  ;;  %vm1270_vm12 = vcmp.eq.s32.totalorder %v1874_v57, %v1754_v12 }
  0xa8   :  { %v1813_v31 = vsel %vm1269_vm3, 27.00293, %v2867_v24  ;;  %vm1272_vm13 = vcmp.eq.s32.totalorder %v1888_v1, %v1754_v12  ;;  %vm1271_vm14 = vcmp.eq.s32.totalorder %v1891_v2, %v1754_v12  ;;  %vm1273_vm15 = vcmp.eq.s32.totalorder %v1896_v6, %v1754_v12 }
  0xa9   :  { %v1773_v19 = vpop.permute.xlu0 %1258  ;;  %vm1290_vm0 = vcmp.eq.s32.totalorder %v1752_v11, %v1904_v8  ;;  %vm1292_vm1 = vcmp.eq.s32.totalorder %v1762_v0, %v1904_v8  ;;  %vm1291_vm2 = vcmp.eq.s32.totalorder %v1759_v14, %v1904_v8  ;;  %vm1293_vm3 = vcmp.eq.s32.totalorder %v1771_v18, %v1904_v8 }
  0xaa   :  { %2873 = vst [vmem:[#allocation8_spill] sm:$0xff] %v1773_v19  ;;  %vm1274_vm4 = vcmp.eq.s32.totalorder %v1752_v11, %v1773_v19  ;;  %vm1275_vm5 = vcmp.eq.s32.totalorder %v1759_v14, %v1773_v19  ;;  %vm1276_vm6 = vcmp.eq.s32.totalorder %v1762_v0, %v1773_v19  ;;  %vm1277_vm7 = vcmp.eq.s32.totalorder %v1771_v18, %v1773_v19 }
  0xab   :  { %v1816_v32 = vsel %vm1274_vm4, 27.00293, %v2867_v24  ;;  %v1831_v39 = vsel %vm1275_vm5, 27.00293, %v2867_v24  ;;  %v1837_v40 = vsel %vm1276_vm6, 27.00293, %v2867_v24  ;;  %vm1278_vm4 = vcmp.eq.s32.totalorder %v1874_v57, %v1773_v19 }
  0xac   :  { %2875 = vst [vmem:[#allocation10_spill] sm:$0xff] %v1837_v40  ;;  %v1849_v45 = vsel %vm1277_vm7, 27.00293, %v2867_v24  ;;  %v1972_v11 = vsel %vm1273_vm15, 27.00293, %v2867_v24  ;;  %vm1280_vm5 = vcmp.eq.s32.totalorder %v1888_v1, %v1773_v19  ;;  %vm1279_vm6 = vcmp.eq.s32.totalorder %v1891_v2, %v1773_v19 }
  0xad   :  { %2876 = vst [vmem:[#allocation11_spill] sm:$0xff] %v1849_v45  ;;  %2892 = vst [vmem:[#allocation27_spill] sm:$0xff] %v1972_v11  ;;  %v1979_v12 = vsel %vm1290_vm0, 27.00293, %v2867_v24  ;;  %v1997_v14 = vsel %vm1291_vm2, 27.00293, %v2867_v24 }
  0xae   :  { %2893 = vst [vmem:[#allocation28_spill] sm:$0xff] %v1979_v12  ;;  %2894 = vst [vmem:[#allocation29_spill] sm:$0xff] %v1997_v14  ;;  %v2896_v57 = vsub.s32 7, %v1750_v10  ;;  %v2015_v34 = vsel %vm1278_vm4, 27.00293, %v2867_v24 }
  0xaf   :  { %2898 = vst [vmem:[#allocation32_spill] sm:$0xff] %v2015_v34  ;;  %v2018_v6 = vsel %vm1280_vm5, 27.00293, %v2867_v24  ;;  %v2024_v0 = vsel %vm1293_vm3, 27.00293, %v2867_v24 }
  0xb0   :  { %v2012_v2 = vrot.slane %v1767_v16, %v2896_v57  ;;  %2899 = vst [vmem:[#allocation33_spill] sm:$0xff] %v2018_v6  ;;  %2900 = vst [vmem:[#allocation34_spill] sm:$0xff] %v2024_v0  ;;  %v2036_v57 = vsel %vm1279_vm6, 27.00293, %v2867_v24 }
  0xb1   :  { %2901 = vst [vmem:[#allocation35_spill] sm:$0xff] %v2036_v57 }
  0xb2   :  { %2897 = vst [vmem:[#allocation31_spill] sm:$0xff] %v2012_v2 }
 0x10a   :  { %v467_v30 = vpop.f32.mrb[0].mxu0  ;;  %v520_v36 = vpop.f32.mrb[0].mxu1 }
 0x10b   :  { %v1822_v35 = vmul.f32 %v1778_v20, %v467_v30  ;;  %v469_v37 = vpop.f32.mrb[1].mxu0  ;;  %v1840_v41 = vmul.f32 %v1781_v21, %v520_v36  ;;  %v522_v43 = vpop.f32.mrb[1].mxu1 }
 0x10c   :  { %v1843_v42 = vmul.f32 %v1788_v22, %v469_v37  ;;  %v471_v44 = vpop.f32.mrb[2].mxu0  ;;  %v524_v48 = vpop.f32.mrb[2].mxu1  ;;  %v1879_v59 = vmul.f32 %v1825_v38, %v522_v43  ;;  %v1940_v43 = vsel %vm1285_vm11, 27.00293, %v2867_v24 }
 0x10d   :  { %v719_v47 = vmul.f32 %v1822_v35, %v1822_v35  ;;  %v721_v51 = vmul.f32 %v1840_v41, %v1840_v41  ;;  %v473_v52 = vpop.f32.mrb[3].mxu0  ;;  %v526_v56 = vpop.f32.mrb[3].mxu1  ;;  %v1882_v60 = vmul.f32 %v1778_v20, %v471_v44  ;;  %v1919_v30 = vmul.f32 %v1781_v21, %v524_v48  ;;  %2888 = vst [vmem:[#allocation23_spill] sm:$0xff] %v1940_v43 }
 0x10e   :  { %v720_v55 = vmul.f32 %v1843_v42, %v1843_v42  ;;  %v722_v4 = vmul.f32 %v1879_v59, %v1879_v59  ;;  %v1943_v44 = vmul.f32 %v1788_v22, %v473_v52  ;;  %v1987_v50 = vmul.f32 %v1825_v38, %v526_v56 }
 0x10f   :  { %v751_v54 = vsub.f32 1.0, %v719_v47  ;;  %v753_v58 = vsub.f32 1.0, %v721_v51  ;;  %v727_v15 = vmul.f32 %v1882_v60, %v1882_v60  ;;  %v1950_v51 = vsel %vm1270_vm12, 27.00293, %v2867_v24 }
 0x110   :  { %v752_v63 = vsub.f32 1.0, %v720_v55  ;;  %v754_v29 = vsub.f32 1.0, %v722_v4  ;;  %2889 = vst [vmem:[#allocation24_spill] sm:$0xff] %v1950_v51  ;;  %v2003_v56 = vsel %vm1292_vm1, 27.00293, %v2867_v24  ;;  %v730_v1 = vmul.f32 %v1987_v50, %v1987_v50 }
 0x111   :  { %v783_v62 = vmax.f32 %v751_v54, 0.0  ;;  %v785_v3 = vmax.f32 %v753_v58, 0.0  ;;  %v759_v52 = vsub.f32 1.0, %v727_v15  ;;  %2895 = vst [vmem:[#allocation30_spill] sm:$0xff] %v2003_v56  ;;  %v2030_v10 = vmul.f32 30.0, %v1822_v35 }
 0x112   :  { %v477_v5 = vpop.f32.mrb[4].mxu0  ;;  %v784_v13 = vmax.f32 %v752_v63, 0.0  ;;  %v1910_v17 = vpop.f32.mrb[4].mxu1  ;;  %v786_v55 = vmax.f32 %v754_v29, 0.0  ;;  %v1964_v63 = vsel %vm1272_vm13, 27.00293, %v2867_v24  ;;  %v728_v29 = vmul.f32 %v1943_v44, %v1943_v44 }
 0x113   :  { %v1906_v9 = vmin.f32 %v783_v62, 1.0  ;;  %v1912_v23 = vpop.f32.mrb[5].mxu0  ;;  %v1916_v26 = vmin.f32 %v785_v3, 1.0  ;;  %v1928_v36 = vpop.f32.mrb[5].mxu1  ;;  %v729_v62 = vmul.f32 %v1919_v30, %v1919_v30  ;;  %2890 = vst [vmem:[#allocation25_spill] sm:$0xff] %v1964_v63  ;;  %v2033_v16 = vmul.f32 %v1778_v20, %v477_v5 }
 0x114   :  { %v1930_v37 = vpop.f32.mrb[6].mxu0  ;;  %v1945_v47 = vpop.f32.mrb[6].mxu1  ;;  %v1957_v54 = vmin.f32 %v784_v13, 1.0  ;;  %v1967_v3 = vsel %vm1271_vm14, 27.00293, %v2867_v24  ;;  %v1981_v4 = vmin.f32 %v786_v55, 1.0 }
 0x115   :  { %1553 = vrsqrt.f32 %v1906_v9  ;;  %v1947_v48 = vpop.f32.mrb[7].mxu0  ;;  %v1959_v58 = vpop.f32.mrb[7].mxu1  ;;  %2891 = vst [vmem:[#allocation26_spill] sm:$0xff] %v1967_v3  ;;  %v791_v13 = vmax.f32 %v759_v52, 0.0  ;;  %v761_v15 = vsub.f32 1.0, %v729_v62  ;;  %v760_v62 = vsub.f32 1.0, %v728_v29 }
 0x116   :  { %1555 = vrsqrt.f32 %v1916_v26  ;;  %v2039_v29 = vmul.f32 -0.122417435, %v1840_v41  ;;  %v762_v8 = vsub.f32 1.0, %v730_v1  ;;  %v2044_v34 = vmul.f32 30.0, %v1840_v41 }
 0x117   :  { %1557 = vrsqrt.f32 %v1957_v54  ;;  %v2005_v55 = vmin.f32 %v791_v13, 1.0  ;;  %v793_v52 = vmax.f32 %v761_v15, 0.0  ;;  %v2027_v15 = vmul.f32 -0.122417435, %v1822_v35 }
 0x118   :  { %1559 = vrsqrt.f32 %v1981_v4  ;;  %v792_v18 = vmax.f32 %v760_v62, 0.0  ;;  %v2047_v0 = vmul.f32 -0.122417435, %v1843_v42  ;;  %v2050_v5 = vmul.f32 30.0, %v1843_v42 }
 0x119   :  { %v2041_v19 = vmin.f32 %v793_v52, 1.0  ;;  %1561 = vrsqrt.f32 %v2005_v55  ;;  %v2055_v57 = vmul.f32 -0.122417435, %v1879_v59  ;;  %v2058_v52 = vmul.f32 30.0, %v1879_v59 }
 0x11a   :  { %v2061_v1 = vmul.f32 -0.122417435, %v1882_v60  ;;  %vm849_vm7 = vcmp.eq.f32.partialorder %v1906_v9, inf  ;;  %v2065_v62 = vmin.f32 %v792_v18, 1.0  ;;  %v735_v56 = vmul.f32 %v2033_v16, %v2033_v16 }
 0x11b   :  { %1563 = vrsqrt.f32 %v2041_v19  ;;  %vm851_vm8 = vcmp.eq.f32.partialorder %v1906_v9, 0.0  ;;  %v794_v14 = vmax.f32 %v762_v8, 0.0  ;;  %vm863_vm9 = vcmp.eq.f32.partialorder %v1916_v26, inf }
 0x11c   :  { %vm865_vm10 = vcmp.eq.f32.partialorder %v1916_v26, 0.0  ;;  %v866_v3 = vand.u32 2147483648, %v1916_v26  ;;  %1565 = vrsqrt.f32 %v2065_v62  ;;  %v2078_v51 = vmul.f32 30.0, %v1882_v60 }
 0x11d   :  { %v2081_v43 = vmul.f32 -0.122417435, %v1919_v30  ;;  %vm856_vm11 = vcmp.eq.f32.partialorder %v1957_v54, inf  ;;  %vm858_vm12 = vcmp.eq.f32.partialorder %v1957_v54, 0.0  ;;  %v2088_v8 = vmul.f32 30.0, %v1919_v30 }
 0x11e   :  { %2902 = vst [vmem:[#allocation36_spill] sm:$0xff] %v2078_v51  ;;  %v767_v7 = vsub.f32 1.0, %v735_v56  ;;  %v859_v61 = vand.u32 2147483648, %v1957_v54  ;;  %v2098_v53 = vmul.f32 -0.122417435, %v1943_v44  ;;  %v2101_v49 = vmul.f32 30.0, %v1943_v44 }
 0x11f   :  { %v1554_v13 = vpop.eup %1553  ;;  %2903 = vst [vmem:[#allocation37_spill] sm:$0xff] %v2088_v8  ;;  %vm870_vm13 = vcmp.eq.f32.partialorder %v1981_v4, inf  ;;  %vm872_vm14 = vcmp.eq.f32.partialorder %v1981_v4, 0.0  ;;  %vm1167_vm15 = vcmp.gt.f32.partialorder %v1822_v35, -0.87758255  ;;  %vm905_vm0 = vcmp.eq.f32.partialorder %v2005_v55, inf }
 0x120   :  { %v1556_v6 = vpop.eup %1555  ;;  %v848_v24 = vmul.f32 %v1554_v13, %v1906_v9  ;;  %v852_v13 = vand.u32 2147483648, %v1906_v9  ;;  %2904 = vst [vmem:[#allocation38_spill] sm:$0xff] %v2101_v49  ;;  %vm1169_vm1 = vcmp.gt.f32.partialorder %v1840_v41, -0.87758255  ;;  %vm907_vm2 = vcmp.eq.f32.partialorder %v2005_v55, 0.0 }
 0x121   :  { %v862_v11 = vmul.f32 %v1556_v6, %v1916_v26  ;;  %v1558_v12 = vpop.eup %1557  ;;  %v2083_v6 = vmin.f32 %v794_v14, 1.0  ;;  %vm919_vm3 = vcmp.eq.f32.partialorder %v2041_v19, inf  ;;  %vm921_vm4 = vcmp.eq.f32.partialorder %v2041_v19, 0.0 }
 0x122   :  { %v1560_v18 = vpop.eup %1559  ;;  %v850_v63 = vsel %vm849_vm7, %v1906_v9, %v848_v24  ;;  %v855_v24 = vmul.f32 %v1558_v12, %v1957_v54  ;;  %v799_v12 = vmax.f32 %v767_v7, 0.0  ;;  %vm912_vm5 = vcmp.eq.f32.partialorder %v2065_v62, inf }
 0x123   :  { %v864_v33 = vsel %vm863_vm9, %v1916_v26, %v862_v11  ;;  %1567 = vrsqrt.f32 %v2083_v6  ;;  %v853_v14 = vsel %vm851_vm8, %v852_v13, %v850_v63  ;;  %v869_v2 = vmul.f32 %v1560_v18, %v1981_v4  ;;  %v1562_v8 = vpop.eup %1561 }
 0x124   :  { %v873_v11 = vand.u32 2147483648, %v1981_v4  ;;  %v867_v9 = vsel %vm865_vm10, %v866_v3, %v864_v33  ;;  %v2112_v63 = vmul.f32 -0.122417435, %v1987_v50  ;;  %v2115_v13 = vmul.f32 30.0, %v1987_v50 }
 0x125   :  { %v2119_v18 = vmul.f32 %v1781_v21, %v1910_v17  ;;  %v1103_v51 = vmul.f32 0.47942555, %v853_v14  ;;  %v857_v26 = vsel %vm856_vm11, %v1957_v54, %v855_v24  ;;  %v2129_v33 = vmin.f32 %v799_v12, 1.0  ;;  %v1564_v46 = vpop.eup %1563 }
 0x126   :  { %2906 = vst [vmem:[#allocation40_spill] sm:$0xff] %v2115_v13  ;;  %v871_v17 = vsel %vm870_vm13, %v1981_v4, %v869_v2  ;;  %v908_v14 = vand.u32 2147483648, %v2005_v55  ;;  %v860_v45 = vsel %vm858_vm12, %v859_v61, %v857_v26  ;;  %vm1168_vm6 = vcmp.gt.f32.partialorder %v1843_v42, -0.87758255 }
 0x127   :  { %v737_v24 = vmul.f32 %v2119_v18, %v2119_v18  ;;  %1569 = vrsqrt.f32 %v2129_v33  ;;  %vm1170_vm7 = vcmp.gt.f32.partialorder %v1879_v59, -0.87758255  ;;  %vm914_vm8 = vcmp.eq.f32.partialorder %v2065_v62, 0.0 }
 0x128   :  { %vm926_vm9 = vcmp.eq.f32.partialorder %v2083_v6, inf  ;;  %vm928_vm10 = vcmp.eq.f32.partialorder %v2083_v6, 0.0  ;;  %vm1175_vm11 = vcmp.gt.f32.partialorder %v1882_v60, -0.87758255  ;;  %vm1177_vm12 = vcmp.gt.f32.partialorder %v1919_v30, -0.87758255 }
 0x129   :  { %vm961_vm13 = vcmp.eq.f32.partialorder %v2129_v33, inf }
 0x12a   :  { %v2106_v56 = vpop.f32.mrb[8].mxu0  ;;  %v2121_v49 = vpop.f32.mrb[8].mxu1 }
 0x12b   :  { %2905 = vst [vmem:[#allocation39_spill] sm:$0xff] %v2106_v56  ;;  %2907 = vst [vmem:[#allocation41_spill] sm:$0xff] %v2121_v49  ;;  %v2123_v7 = vpop.f32.mrb[9].mxu0  ;;  %v2131_v3 = vpop.f32.mrb[9].mxu1  ;;  %v2151_v49 = vmul.f32 %v1788_v22, %v1912_v23  ;;  %v918_v23 = vmul.f32 %v1564_v46, %v2041_v19 }
 0x12c   :  { %2908 = vst [vmem:[#allocation42_spill] sm:$0xff] %v2123_v7  ;;  %2909 = vst [vmem:[#allocation43_spill] sm:$0xff] %v2131_v3  ;;  %v2133_v13 = vpop.f32.mrb[10].mxu0  ;;  %v2143_v12 = vpop.f32.mrb[10].mxu1  ;;  %v1105_v3 = vmul.f32 0.47942555, %v867_v9 }
 0x12d   :  { %2910 = vst [vmem:[#allocation44_spill] sm:$0xff] %v2133_v13  ;;  %2911 = vst [vmem:[#allocation45_spill] sm:$0xff] %v2143_v12  ;;  %v2145_v7 = vpop.f32.mrb[11].mxu0  ;;  %v904_v13 = vmul.f32 %v1562_v8, %v2005_v55  ;;  %v2153_v2 = vpop.f32.mrb[11].mxu1  ;;  %v2159_v12 = vmul.f32 -0.122417435, %v2033_v16  ;;  %v1135_v8 = vsub.f32 %v2027_v15, %v1103_v51  ;;  %v736_v51 = vmul.f32 %v2151_v49, %v2151_v49 }
 0x12e   :  { %2912 = vst [vmem:[#allocation46_spill] sm:$0xff] %v2145_v7  ;;  %2913 = vst [vmem:[#allocation47_spill] sm:$0xff] %v2153_v2  ;;  %v1566_v56 = vpop.eup %1565  ;;  %v769_v9 = vsub.f32 1.0, %v737_v24  ;;  %v874_v7 = vsel %vm872_vm14, %v873_v11, %v871_v17  ;;  %v922_v2 = vand.u32 2147483648, %v2041_v19  ;;  %v1137_v40 = vsub.f32 %v2039_v29, %v1105_v3 }
 0x12f   :  { %v911_v54 = vmul.f32 %v1566_v56, %v2065_v62  ;;  %v1568_v26 = vpop.eup %1567  ;;  %v1104_v24 = vmul.f32 0.47942555, %v860_v45  ;;  %v906_v46 = vsel %vm905_vm0, %v2005_v55, %v904_v13  ;;  %v1106_v15 = vmul.f32 0.47942555, %v874_v7 }
 0x130   :  { %v801_v61 = vmax.f32 %v769_v9, 0.0  ;;  %v915_v11 = vand.u32 2147483648, %v2065_v62  ;;  %v2183_v45 = vmul.f32 %v1825_v38, %v1928_v36  ;;  %v2191_v13 = vsel %vm1167_vm15, %v1135_v8, -0.23971277 }
 0x131   :  { %v920_v7 = vsel %vm919_vm3, %v2041_v19, %v918_v23  ;;  %v768_v17 = vsub.f32 1.0, %v736_v51  ;;  %v909_v9 = vsel %vm907_vm2, %v908_v14, %v906_v46  ;;  %v913_v36 = vsel %vm912_vm5, %v2065_v62, %v911_v54 }
 0x132   :  { %v2177_v4 = vpop.f32.mrb[12].mxu0  ;;  %v2185_v29 = vpop.f32.mrb[12].mxu1  ;;  %v2196_v3 = vmin.f32 %v801_v61, 1.0  ;;  %v2211_v23 = vsel %vm1169_vm1, %v1137_v40, -0.23971277  ;;  %v1136_v61 = vsub.f32 %v2047_v0, %v1104_v24  ;;  %v929_v55 = vand.u32 2147483648, %v2083_v6 }
 0x133   :  { %v2187_v56 = vpop.f32.mrb[13].mxu0  ;;  %v2205_v35 = vpop.f32.mrb[13].mxu1  ;;  %v923_v46 = vsel %vm921_vm4, %v922_v2, %v920_v7  ;;  %v800_v41 = vmax.f32 %v768_v17, 0.0  ;;  %v738_v40 = vmul.f32 %v2183_v45, %v2183_v45  ;;  %v1111_v51 = vmul.f32 0.47942555, %v909_v9 }
 0x134   :  { %2914 = vst [vmem:[#allocation48_spill] sm:$0xff] %v2187_v56  ;;  %v925_v56 = vmul.f32 %v1568_v26, %v2083_v6  ;;  %v2207_v8 = vpop.f32.mrb[14].mxu0  ;;  %v2216_v14 = vpop.f32.mrb[14].mxu1  ;;  %v1138_v26 = vsub.f32 %v2055_v57, %v1106_v15  ;;  %1571 = vrsqrt.f32 %v2196_v3  ;;  %v2233_v57 = vmul.f32 %v1778_v20, %v1930_v37 }
 0x135   :  { %2915 = vst [vmem:[#allocation49_spill] sm:$0xff] %v2216_v14  ;;  %v2218_v54 = vpop.f32.mrb[15].mxu0  ;;  %v2226_v0 = vpop.f32.mrb[15].mxu1  ;;  %v916_v14 = vsel %vm914_vm8, %v915_v11, %v913_v36  ;;  %v2240_v15 = vmin.f32 %v800_v41, 1.0  ;;  %v770_v7 = vsub.f32 1.0, %v738_v40  ;;  %v2244_v62 = vmul.f32 30.0, %v2033_v16 }
 0x136   :  { %v1570_v24 = vpop.eup %1569  ;;  %v927_v19 = vsel %vm926_vm9, %v2083_v6, %v925_v56  ;;  %v1113_v17 = vmul.f32 0.47942555, %v923_v46  ;;  %v743_v20 = vmul.f32 %v2233_v57, %v2233_v57  ;;  %v2250_v37 = vsel %vm1168_vm6, %v1136_v61, -0.23971277 }
 0x137   :  { %v960_v2 = vmul.f32 %v1570_v24, %v2129_v33  ;;  %v2254_v11 = vsel %vm1170_vm7, %v1138_v26, -0.23971277  ;;  %vm963_vm14 = vcmp.eq.f32.partialorder %v2129_v33, 0.0  ;;  %v964_v56 = vand.u32 2147483648, %v2129_v33 }
 0x138   :  { %v1143_v9 = vsub.f32 %v2061_v1, %v1111_v51  ;;  %v1112_v36 = vmul.f32 0.47942555, %v916_v14  ;;  %vm1176_vm15 = vcmp.gt.f32.partialorder %v1943_v44, -0.87758255  ;;  %v930_v46 = vsel %vm928_vm10, %v929_v55, %v927_v19 }
 0x139   :  { %v802_v41 = vmax.f32 %v770_v7, 0.0  ;;  %v962_v42 = vsel %vm961_vm13, %v2129_v33, %v960_v2  ;;  %1573 = vrsqrt.f32 %v2240_v15  ;;  %v775_v59 = vsub.f32 1.0, %v743_v20 }
 0x13a   :  { %v2266_v61 = vmul.f32 %v1781_v21, %v1945_v47  ;;  %v1145_v26 = vsub.f32 %v2081_v43, %v1113_v17  ;;  %vm1178_vm0 = vcmp.gt.f32.partialorder %v1987_v50, -0.87758255  ;;  %v2271_v1 = vmul.f32 -0.122417435, %v2119_v18 }
 0x13b   :  { %v2273_v14 = vmin.f32 %v802_v41, 1.0  ;;  %v2277_v6 = vmul.f32 %v1788_v22, %v1947_v48  ;;  %v1114_v55 = vmul.f32 0.47942555, %v930_v46  ;;  %v2280_v40 = vmul.f32 30.0, %v2119_v18 }
 0x13c   :  { %v807_v24 = vmax.f32 %v775_v59, 0.0  ;;  %v745_v21 = vmul.f32 %v2266_v61, %v2266_v61  ;;  %v2286_v43 = vsel %vm1175_vm11, %v1143_v9, -0.23971277  ;;  %v965_v47 = vsel %vm963_vm14, %v964_v56, %v962_v42 }
 0x13d   :  { %v2291_v51 = vmul.f32 -0.122417435, %v2151_v49  ;;  %1575 = vrsqrt.f32 %v2273_v14  ;;  %v1144_v22 = vsub.f32 %v2098_v53, %v1112_v36  ;;  %v2299_v2 = vmul.f32 %v1825_v38, %v1959_v58 }
 0x13e   :  { %v2295_v48 = vmin.f32 %v807_v24, 1.0  ;;  %v777_v19 = vsub.f32 1.0, %v745_v21  ;;  %v1572_v60 = vpop.eup %1571  ;;  %v2303_v7 = vsel %vm1177_vm12, %v1145_v26, -0.23971277  ;;  %vm1183_vm1 = vcmp.gt.f32.partialorder %v2033_v16, -0.87758255 }
 0x13f   :  { %vm975_vm2 = vcmp.eq.f32.partialorder %v2196_v3, inf  ;;  %v2308_v33 = vmul.f32 30.0, %v2151_v49  ;;  %v744_v53 = vmul.f32 %v2277_v6, %v2277_v6  ;;  %v1146_v17 = vsub.f32 %v2112_v63, %v1114_v55 }
 0x140   :  { %v1119_v20 = vmul.f32 0.47942555, %v965_v47  ;;  %vm977_vm3 = vcmp.eq.f32.partialorder %v2196_v3, 0.0  ;;  %1577 = vrsqrt.f32 %v2295_v48  ;;  %v978_v38 = vand.u32 2147483648, %v2196_v3 }
 0x141   :  { %v2317_v30 = vmul.f32 -0.122417435, %v2183_v45  ;;  %v809_v58 = vmax.f32 %v777_v19, 0.0  ;;  %v776_v56 = vsub.f32 1.0, %v744_v53  ;;  %v1208_v9 = vsel %vm1176_vm15, %v1144_v22, -0.23971277 }
 0x142   :  { %v974_v36 = vmul.f32 %v1572_v60, %v2196_v3  ;;  %v2323_v46 = vmul.f32 30.0, %v2183_v45  ;;  %v746_v63 = vmul.f32 %v2299_v2, %v2299_v2  ;;  %v2328_v41 = vmul.f32 -0.122417435, %v2233_v57 }
 0x143   :  { %v2331_v42 = vmul.f32 30.0, %v2233_v57  ;;  %v2333_v59 = vmin.f32 %v809_v58, 1.0  ;;  %v808_v26 = vmax.f32 %v776_v56, 0.0  ;;  %v1574_v55 = vpop.eup %1573  ;;  %v1210_v44 = vsel %vm1178_vm0, %v1146_v17, -0.23971277 }
 0x144   :  { %v1151_v24 = vsub.f32 %v2159_v12, %v1119_v20  ;;  %vm968_vm4 = vcmp.eq.f32.partialorder %v2240_v15, inf  ;;  %v778_v21 = vsub.f32 1.0, %v746_v63  ;;  %vm970_vm5 = vcmp.eq.f32.partialorder %v2240_v15, 0.0 }
 0x145   :  { %v971_v47 = vand.u32 2147483648, %v2240_v15  ;;  %1579 = vrsqrt.f32 %v2333_v59  ;;  %v1362_v22 = vmul.f32 %v1796_v25, %v2191_v13  ;;  %v976_v19 = vsel %vm975_vm2, %v2196_v3, %v974_v36 }
 0x146   :  { %v2348_v50 = vmul.f32 -0.122417435, %v2266_v61  ;;  %v2350_v12 = vmin.f32 %v808_v26, 1.0  ;;  %v1363_v60 = vmul.f32 %v1804_v27, %v2250_v37  ;;  %v967_v17 = vmul.f32 %v1574_v55, %v2240_v15 }
 0x147   :  { %v1576_v53 = vpop.eup %1575  ;;  %v810_v20 = vmax.f32 %v778_v21, 0.0  ;;  %v1364_v58 = vmul.f32 %v1807_v28, %v2211_v23  ;;  %v1365_v25 = vmul.f32 %v1813_v31, %v2254_v11  ;;  %v2361_v13 = vsel %vm1183_vm1, %v1151_v24, -0.23971277  ;;  %v2916_v24 = vld [vmem:[#allocation10_spill] sm:$0xff] }
 0x148   :  { %vm982_vm6 = vcmp.eq.f32.partialorder %v2273_v14, inf  ;;  %vm984_vm7 = vcmp.eq.f32.partialorder %v2273_v14, 0.0  ;;  %1581 = vrsqrt.f32 %v2350_v12  ;;  %v979_v27 = vsel %vm977_vm3, %v978_v38, %v976_v19  ;;  %v2917_v19 = vld [vmem:[#allocation11_spill] sm:$0xff] }
 0x149   :  { %v981_v37 = vmul.f32 %v1576_v53, %v2273_v14  ;;  %v985_v28 = vand.u32 2147483648, %v2273_v14  ;;  %v1394_v23 = vadd.f32 %v1362_v22, %v2030_v10  ;;  %v2371_v11 = vmin.f32 %v810_v20, 1.0  ;;  %v2918_v53 = vld [vmem:[#allocation39_spill] sm:$0xff] }
 0x14a   :  { %v1578_v31 = vpop.eup %1577  ;;  %v1395_v16 = vadd.f32 %v1363_v60, %v2050_v5  ;;  %v1396_v56 = vadd.f32 %v1364_v58, %v2044_v34  ;;  %v1397_v36 = vadd.f32 %v1365_v25, %v2058_v52  ;;  %v969_v3 = vsel %vm968_vm4, %v2240_v15, %v967_v17  ;;  %v2919_v17 = vld [vmem:[#allocation12_spill] sm:$0xff]  ;;  %v2922_v15 = vld [vmem:[#allocation37_spill] sm:$0xff] }
 0x14b   :  { %vm1017_vm8 = vcmp.eq.f32.partialorder %v2295_v48, inf  ;;  %vm1019_vm9 = vcmp.eq.f32.partialorder %v2295_v48, 0.0  ;;  %v2382_v38 = vmul.f32 30.0, %v2266_v61  ;;  %1426 = vst [vmem:[#allocation5] sm:$0xff] %v1394_v23  ;;  %v2384_v10 = vmul.f32 0.47942555, %v979_v27 }
 0x14c   :  { %v1016_v5 = vmul.f32 %v1578_v31, %v2295_v48  ;;  %v1020_v34 = vand.u32 2147483648, %v2295_v48  ;;  %v2389_v52 = vmul.f32 -0.122417435, %v2277_v6  ;;  %1427 = vst [vmem:[#allocation5 + $0x8] sm:$0xff] %v1395_v16  ;;  %1428 = vst [vmem:[#allocation5 + $0x10] sm:$0xff] %v1396_v56  ;;  %v983_v63 = vsel %vm982_vm6, %v2273_v14, %v981_v37  ;;  %v2923_v27 = vld [vmem:[#allocation40_spill] sm:$0xff] }
 0x14d   :  { %1429 = vst [vmem:[#allocation5 + $0x18] sm:$0xff] %v1397_v36  ;;  %v1370_v26 = vmul.f32 %v1816_v32, %v2286_v43  ;;  %v1371_v55 = vmul.f32 %v1831_v39, %v1208_v9  ;;  %v1372_v21 = vmul.f32 %v2916_v24, %v2303_v7  ;;  %v972_v22 = vsel %vm970_vm5, %v971_v47, %v969_v3  ;;  %v2920_v39 = vld [vmem:[#allocation36_spill] sm:$0xff]  ;;  %v2921_v7 = vld [vmem:[#allocation38_spill] sm:$0xff]  ;;  %v2924_v3 = vld [vmem:[#allocation41_spill] sm:$0xff] }
 0x14e   :  { %1583 = vrsqrt.f32 %v2371_v11  ;;  %v1373_v60 = vmul.f32 %v2917_v19, %v1210_v44  ;;  %v2405_v20 = vmul.f32 %v2919_v17, %v2918_v53  ;;  %vm1185_vm10 = vcmp.gt.f32.partialorder %v2119_v18, -0.87758255 }
 0x14f   :  { %v1580_v58 = vpop.eup %1579  ;;  %v2409_v32 = vmul.f32 30.0, %v2277_v6  ;;  %v1402_v43 = vadd.f32 %v1370_v26, %v2920_v39  ;;  %v1403_v9 = vadd.f32 %v1371_v55, %v2921_v7  ;;  %v1404_v47 = vadd.f32 %v1372_v21, %v2922_v15 }
 0x150   :  { %vm1184_vm11 = vcmp.gt.f32.partialorder %v2151_v49, -0.87758255  ;;  %v986_v44 = vsel %vm984_vm7, %v985_v28, %v983_v63  ;;  %v1018_v25 = vsel %vm1017_vm8, %v2295_v48, %v1016_v5  ;;  %v1405_v37 = vadd.f32 %v1373_v60, %v2923_v27  ;;  %v2925_v5 = vld [vmem:[#allocation13_spill] sm:$0xff] }
 0x151   :  { %v723_v23 = vmul.f32 %v2405_v20, %v2405_v20  ;;  %v1153_v31 = vsub.f32 %v2271_v1, %v2384_v10  ;;  %v1120_v16 = vmul.f32 0.47942555, %v972_v22  ;;  %v1030_v56 = vmul.f32 %v1580_v58, %v2333_v59  ;;  %1434 = vst [vmem:[#allocation5 + $0x40] sm:$0xff] %v1402_v43  ;;  %1435 = vst [vmem:[#allocation5 + $0x48] sm:$0xff] %v1403_v9  ;;  %v2926_v1 = vld [vmem:[#allocation42_spill] sm:$0xff] }
 0x152   :  { %v2427_v36 = vmul.f32 -0.122417435, %v2299_v2  ;;  %1436 = vst [vmem:[#allocation5 + $0x50] sm:$0xff] %v1404_v47  ;;  %v1582_v14 = vpop.eup %1581  ;;  %vm1186_vm12 = vcmp.gt.f32.partialorder %v2183_v45, -0.87758255  ;;  %vm1031_vm13 = vcmp.eq.f32.partialorder %v2333_v59, inf  ;;  %v2433_v63 = vmul.f32 %v2925_v5, %v2924_v3 }
 0x153   :  { %1437 = vst [vmem:[#allocation5 + $0x58] sm:$0xff] %v1405_v37  ;;  %v755_v28 = vsub.f32 1.0, %v723_v23  ;;  %v2927_v10 = vld [vmem:[#allocation14_spill] sm:$0xff]  ;;  %v1122_v55 = vmul.f32 0.47942555, %v986_v44  ;;  %v1021_v24 = vsel %vm1019_vm9, %v1020_v34, %v1018_v25  ;;  %v1023_v21 = vmul.f32 %v1582_v14, %v2350_v12  ;;  %v2928_v47 = vld [vmem:[#allocation43_spill] sm:$0xff] }
 0x154   :  { %v2437_v26 = vmul.f32 %v2927_v10, %v2926_v1  ;;  %vm1024_vm14 = vcmp.eq.f32.partialorder %v2350_v12, inf  ;;  %vm1033_vm15 = vcmp.eq.f32.partialorder %v2333_v59, 0.0  ;;  %v1034_v22 = vand.u32 2147483648, %v2333_v59  ;;  %v2929_v44 = vld [vmem:[#allocation31_spill] sm:$0xff] }
 0x155   :  { %v787_v19 = vmax.f32 %v755_v28, 0.0  ;;  %v725_v60 = vmul.f32 %v2433_v63, %v2433_v63  ;;  %v1152_v53 = vsub.f32 %v2291_v51, %v1120_v16  ;;  %vm1191_vm0 = vcmp.gt.f32.partialorder %v2233_v57, -0.87758255 }
 0x156   :  { %v1032_v58 = vsel %vm1031_vm13, %v2333_v59, %v1030_v56  ;;  %v1027_v48 = vand.u32 2147483648, %v2350_v12  ;;  %v724_v34 = vmul.f32 %v2437_v26, %v2437_v26  ;;  %v1127_v39 = vmul.f32 0.47942555, %v1021_v24 }
 0x157   :  { %v1025_v43 = vsel %vm1024_vm14, %v2350_v12, %v1023_v21  ;;  %vm1026_vm1 = vcmp.eq.f32.partialorder %v2350_v12, 0.0  ;;  %v2455_v7 = vmin.f32 %v787_v19, 1.0  ;;  %v1154_v9 = vsub.f32 %v2317_v30, %v1122_v55 }
 0x158   :  { %v757_v15 = vsub.f32 1.0, %v725_v60  ;;  %v756_v51 = vsub.f32 1.0, %v724_v34  ;;  %v2460_v25 = vmul.f32 %v2929_v44, %v2928_v47  ;;  %v1584_v27 = vpop.eup %1583  ;;  %v1217_v37 = vsel %vm1185_vm10, %v1153_v31, -0.23971277  ;;  %v2931_v60 = vld [vmem:[#allocation22_spill] sm:$0xff]  ;;  %v2933_v47 = vld [vmem:[#allocation23_spill] sm:$0xff] }
 0x159   :  { %v1035_v23 = vsel %vm1033_vm15, %v1034_v22, %v1032_v58  ;;  %v2467_v16 = vmul.f32 30.0, %v2299_v2  ;;  %1585 = vrsqrt.f32 %v2455_v7  ;;  %v1216_v30 = vsel %vm1184_vm11, %v1152_v53, -0.23971277  ;;  %v2930_v22 = vld [vmem:[#allocation16_spill] sm:$0xff] }
 0x15a   :  { %v1028_v12 = vsel %vm1026_vm1, %v1027_v48, %v1025_v43  ;;  %vm1038_vm2 = vcmp.eq.f32.partialorder %v2371_v11, inf  ;;  %vm1040_vm3 = vcmp.eq.f32.partialorder %v2371_v11, 0.0  ;;  %v1159_v56 = vsub.f32 %v2328_v41, %v1127_v39 }
 0x15b   :  { %vm1193_vm4 = vcmp.gt.f32.partialorder %v2266_v61, -0.87758255  ;;  %v1041_v18 = vand.u32 2147483648, %v2371_v11  ;;  %v789_v59 = vmax.f32 %v757_v15, 0.0  ;;  %v788_v31 = vmax.f32 %v756_v51, 0.0  ;;  %v2932_v15 = vld [vmem:[#allocation20_spill] sm:$0xff] }
 0x15c   :  { %v1218_v14 = vsel %vm1186_vm12, %v1154_v9, -0.23971277  ;;  %v1129_v28 = vmul.f32 0.47942555, %v1035_v23  ;;  %v1037_v49 = vmul.f32 %v1584_v27, %v2371_v11  ;;  %v726_v3 = vmul.f32 %v2460_v25, %v2460_v25 }
 0x15d   :  { %v1128_v1 = vmul.f32 0.47942555, %v1028_v12  ;;  %v2483_v55 = vmul.f32 -0.122417435, %v2405_v20  ;;  %v2485_v41 = vmin.f32 %v789_v59, 1.0  ;;  %v2487_v24 = vmin.f32 %v788_v31, 1.0 }
 0x15e   :  { %vm1192_vm5 = vcmp.gt.f32.partialorder %v2277_v6, -0.87758255  ;;  %v2491_v21 = vmul.f32 30.0, %v2405_v20  ;;  %v758_v45 = vsub.f32 1.0, %v726_v3  ;;  %v1378_v19 = vmul.f32 %v2930_v22, %v2361_v13 }
 0x15f   :  { %v1379_v53 = vmul.f32 %v2931_v60, %v1216_v30  ;;  %v2498_v58 = vsel %vm1191_vm0, %v1159_v56, -0.23971277  ;;  %1587 = vrsqrt.f32 %v2485_v41  ;;  %v2502_v48 = vmul.f32 -0.122417435, %v2433_v63  ;;  %v2934_v30 = vld [vmem:[#allocation44_spill] sm:$0xff]  ;;  %v2935_v56 = vld [vmem:[#allocation45_spill] sm:$0xff] }
 0x160   :  { %v2505_v34 = vmul.f32 30.0, %v2433_v63  ;;  %v1161_v39 = vsub.f32 %v2348_v50, %v1129_v28  ;;  %v1039_v13 = vsel %vm1038_vm2, %v2371_v11, %v1037_v49  ;;  %1589 = vrsqrt.f32 %v2487_v24 }
 0x161   :  { %v2513_v57 = vmul.f32 -0.122417435, %v2437_v26  ;;  %v1160_v43 = vsub.f32 %v2389_v52, %v1128_v1  ;;  %v790_v9 = vmax.f32 %v758_v45, 0.0  ;;  %v1380_v51 = vmul.f32 %v2932_v15, %v1217_v37 }
 0x162   :  { %v1381_v27 = vmul.f32 %v2933_v47, %v1218_v14  ;;  %v1410_v23 = vadd.f32 %v1378_v19, %v2244_v62  ;;  %v1411_v50 = vadd.f32 %v1379_v53, %v2308_v33  ;;  %v2522_v12 = vmul.f32 %v2919_v17, %v2934_v30 }
 0x163   :  { %v2526_v59 = vmul.f32 %v2925_v5, %v2935_v56  ;;  %v1586_v31 = vpop.eup %1585  ;;  %v1042_v52 = vsel %vm1040_vm3, %v1041_v18, %v1039_v13  ;;  %vm1171_vm6 = vcmp.gt.f32.partialorder %v2405_v20, -0.87758255  ;;  %v2531_v37 = vmin.f32 %v790_v9, 1.0  ;;  %v2936_v18 = vld [vmem:[#allocation46_spill] sm:$0xff] }
 0x164   :  { %v1412_v62 = vadd.f32 %v1380_v51, %v2280_v40  ;;  %v1413_v33 = vadd.f32 %v1381_v27, %v2323_v46  ;;  %v2537_v14 = vsel %vm1193_vm4, %v1161_v39, -0.23971277  ;;  %v876_v28 = vmul.f32 %v1586_v31, %v2455_v7  ;;  %1442 = vst [vmem:[#allocation5 + $0x80] sm:$0xff] %v1410_v23  ;;  %1443 = vst [vmem:[#allocation5 + $0x88] sm:$0xff] %v1411_v50 }
 0x165   :  { %v731_v11 = vmul.f32 %v2522_v12, %v2522_v12  ;;  %v2544_v49 = vmul.f32 %v2927_v10, %v2936_v18  ;;  %vm877_vm7 = vcmp.eq.f32.partialorder %v2455_v7, inf  ;;  %vm879_vm8 = vcmp.eq.f32.partialorder %v2455_v7, 0.0 }
 0x166   :  { %v880_v40 = vand.u32 2147483648, %v2455_v7  ;;  %1591 = vrsqrt.f32 %v2531_v37  ;;  %1444 = vst [vmem:[#allocation5 + $0x90] sm:$0xff] %v1412_v62  ;;  %1445 = vst [vmem:[#allocation5 + $0x98] sm:$0xff] %v1413_v33  ;;  %v2550_v61 = vmul.f32 0.47942555, %v1042_v52  ;;  %v878_v46 = vsel %vm877_vm7, %v2455_v7, %v876_v28  ;;  %v2938_v33 = vld [vmem:[#allocation24_spill] sm:$0xff] }
 0x167   :  { %v763_v3 = vsub.f32 1.0, %v731_v11  ;;  %v733_v1 = vmul.f32 %v2526_v59, %v2526_v59  ;;  %v2557_v45 = vsel %vm1192_vm5, %v1160_v43, -0.23971277  ;;  %v2560_v19 = vmul.f32 30.0, %v2437_v26  ;;  %v2937_v43 = vld [vmem:[#allocation47_spill] sm:$0xff] }
 0x168   :  { %v881_v22 = vsel %vm879_vm8, %v880_v40, %v878_v46  ;;  %v2563_v60 = vmul.f32 -0.122417435, %v2460_v25  ;;  %v732_v7 = vmul.f32 %v2544_v49, %v2544_v49  ;;  %vm891_vm9 = vcmp.eq.f32.partialorder %v2485_v41, inf }
 0x169   :  { %v1107_v53 = vmul.f32 0.47942555, %v881_v22  ;;  %v795_v39 = vmax.f32 %v763_v3, 0.0  ;;  %v765_v13 = vsub.f32 1.0, %v733_v1  ;;  %v1588_v9 = vpop.eup %1587  ;;  %vm893_vm10 = vcmp.eq.f32.partialorder %v2485_v41, 0.0 }
 0x16a   :  { %v894_v6 = vand.u32 2147483648, %v2485_v41  ;;  %vm1173_vm11 = vcmp.gt.f32.partialorder %v2433_v63, -0.87758255  ;;  %v2573_v15 = vmul.f32 %v2929_v44, %v2937_v43  ;;  %v1590_v51 = vpop.eup %1589  ;;  %v890_v27 = vmul.f32 %v1588_v9, %v2485_v41 }
 0x16b   :  { %v1139_v47 = vsub.f32 %v2483_v55, %v1107_v53  ;;  %vm1172_vm12 = vcmp.gt.f32.partialorder %v2437_v26, -0.87758255  ;;  %v2578_v23 = vmin.f32 %v795_v39, 1.0  ;;  %v797_v50 = vmax.f32 %v765_v13, 0.0 }
 0x16c   :  { %vm1194_vm13 = vcmp.gt.f32.partialorder %v2299_v2, -0.87758255  ;;  %v883_v30 = vmul.f32 %v1590_v51, %v2487_v24  ;;  %vm884_vm14 = vcmp.eq.f32.partialorder %v2487_v24, inf  ;;  %v764_v56 = vsub.f32 1.0, %v732_v7 }
 0x16d   :  { %v734_v31 = vmul.f32 %v2573_v15, %v2573_v15  ;;  %v1203_v55 = vsel %vm1171_vm6, %v1139_v47, -0.23971277  ;;  %v892_v52 = vsel %vm891_vm9, %v2485_v41, %v890_v27  ;;  %v887_v62 = vand.u32 2147483648, %v2487_v24  ;;  %v2940_v27 = vld [vmem:[#allocation26_spill] sm:$0xff] }
 0x16e   :  { %1593 = vrsqrt.f32 %v2578_v23  ;;  %v1366_v28 = vmul.f32 %v2938_v33, %v1203_v55  ;;  %v895_v11 = vsel %vm893_vm10, %v894_v6, %v892_v52  ;;  %v885_v18 = vsel %vm884_vm14, %v2487_v24, %v883_v30  ;;  %v2939_v6 = vld [vmem:[#allocation25_spill] sm:$0xff] }
 0x16f   :  { %vm886_vm15 = vcmp.eq.f32.partialorder %v2487_v24, 0.0  ;;  %v1162_v20 = vsub.f32 %v2427_v36, %v2550_v61  ;;  %v1109_v40 = vmul.f32 0.47942555, %v895_v11  ;;  %v2599_v3 = vmin.f32 %v797_v50, 1.0 }
 0x170   :  { %v888_v46 = vsel %vm886_vm15, %v887_v62, %v885_v18  ;;  %v1592_v1 = vpop.eup %1591  ;;  %v1398_v22 = vadd.f32 %v1366_v28, %v2491_v21  ;;  %v796_v39 = vmax.f32 %v764_v56, 0.0  ;;  %v766_v13 = vsub.f32 1.0, %v734_v31  ;;  %v2941_v28 = vld [vmem:[#allocation28_spill] sm:$0xff]  ;;  %v2942_v18 = vld [vmem:[#allocation29_spill] sm:$0xff] }
 0x171   :  { %v1108_v53 = vmul.f32 0.47942555, %v888_v46  ;;  %v1141_v41 = vsub.f32 %v2502_v48, %v1109_v40  ;;  %v897_v7 = vmul.f32 %v1592_v1, %v2531_v37  ;;  %vm1174_vm0 = vcmp.gt.f32.partialorder %v2460_v25, -0.87758255  ;;  %v2943_v40 = vld [vmem:[#allocation27_spill] sm:$0xff] }
 0x172   :  { %1595 = vrsqrt.f32 %v2599_v3  ;;  %1430 = vst [vmem:[#allocation5 + $0x20] sm:$0xff] %v1398_v22  ;;  %vm898_vm1 = vcmp.eq.f32.partialorder %v2531_v37, inf  ;;  %v901_v24 = vand.u32 2147483648, %v2531_v37  ;;  %v2609_v61 = vmin.f32 %v796_v39, 1.0  ;;  %v2944_v22 = vld [vmem:[#allocation30_spill] sm:$0xff] }
 0x173   :  { %v1140_v36 = vsub.f32 %v2513_v57, %v1108_v53  ;;  %v1205_v21 = vsel %vm1173_vm11, %v1141_v41, -0.23971277  ;;  %v899_v48 = vsel %vm898_vm1, %v2531_v37, %v897_v7  ;;  %vm900_vm2 = vcmp.eq.f32.partialorder %v2531_v37, 0.0  ;;  %v2945_v39 = vld [vmem:[#allocation34_spill] sm:$0xff] }
 0x174   :  { %v798_v9 = vmax.f32 %v766_v13, 0.0  ;;  %v1368_v43 = vmul.f32 %v2939_v6, %v1205_v21  ;;  %v902_v57 = vsel %vm900_vm2, %v901_v24, %v899_v48  ;;  %1597 = vrsqrt.f32 %v2609_v61 }
 0x175   :  { %v1204_v51 = vsel %vm1172_vm12, %v1140_v36, -0.23971277  ;;  %v1226_v47 = vsel %vm1194_vm13, %v1162_v20, -0.23971277  ;;  %v1110_v63 = vmul.f32 0.47942555, %v902_v57  ;;  %v1386_v11 = vmul.f32 %v2941_v28, %v2498_v58 }
 0x176   :  { %v1367_v50 = vmul.f32 %v2940_v27, %v1204_v51  ;;  %v1305_v30 = vmul.f32 30.0, %v2460_v25  ;;  %v1400_v56 = vadd.f32 %v1368_v43, %v2505_v34  ;;  %v1083_v37 = vmul.f32 -0.122417435, %v2522_v12 }
 0x177   :  { %v2626_v31 = vmul.f32 30.0, %v2522_v12  ;;  %v2628_v26 = vmin.f32 %v798_v9, 1.0  ;;  %v1142_v2 = vsub.f32 %v2563_v60, %v1110_v63  ;;  %vm1179_vm3 = vcmp.gt.f32.partialorder %v2522_v12, -0.87758255 }
 0x178   :  { %v1594_v55 = vpop.eup %1593  ;;  %v1399_v52 = vadd.f32 %v1367_v50, %v2560_v19  ;;  %v1085_v62 = vmul.f32 -0.122417435, %v2526_v59  ;;  %v2635_v33 = vmul.f32 30.0, %v2526_v59  ;;  %1432 = vst [vmem:[#allocation5 + $0x30] sm:$0xff] %v1400_v56  ;;  %vm933_vm4 = vcmp.eq.f32.partialorder %v2578_v23, inf }
 0x179   :  { %v932_v34 = vmul.f32 %v1594_v55, %v2578_v23  ;;  %vm935_vm5 = vcmp.eq.f32.partialorder %v2578_v23, 0.0  ;;  %1599 = vrsqrt.f32 %v2628_v26  ;;  %v1206_v19 = vsel %vm1174_vm0, %v1142_v2, -0.23971277 }
 0x17a   :  { %1431 = vst [vmem:[#allocation5 + $0x28] sm:$0xff] %v1399_v52  ;;  %v936_v60 = vand.u32 2147483648, %v2578_v23  ;;  %v1387_v20 = vmul.f32 %v2942_v18, %v2557_v45  ;;  %v1369_v46 = vmul.f32 %v2943_v40, %v1206_v19  ;;  %v1388_v53 = vmul.f32 %v2944_v22, %v2537_v14  ;;  %v2948_v40 = vld [vmem:[#allocation8_spill] sm:$0xff] }
 0x17b   :  { %v934_v1 = vsel %vm933_vm4, %v2578_v23, %v932_v34  ;;  %v1389_v13 = vmul.f32 %v2945_v39, %v1226_v47  ;;  %vm1181_vm6 = vcmp.gt.f32.partialorder %v2526_v59, -0.87758255  ;;  %v1418_v7 = vadd.f32 %v1386_v11, %v2331_v42  ;;  %v2949_v59 = vld [vmem:[#allocation19_spill] sm:$0xff] }
 0x17c   :  { %v1596_v41 = vpop.eup %1595  ;;  %v937_v25 = vsel %vm935_vm5, %v936_v60, %v934_v1  ;;  %v1419_v58 = vadd.f32 %v1387_v20, %v2409_v32  ;;  %v2658_v45 = vmul.f32 %v2919_v17, %v2177_v4  ;;  %v1401_v36 = vadd.f32 %v1369_v46, %v1305_v30  ;;  %v2947_v60 = vld [vmem:[#allocation33_spill] sm:$0xff] }
 0x17d   :  { %v1115_v24 = vmul.f32 0.47942555, %v937_v25  ;;  %v946_v23 = vmul.f32 %v1596_v41, %v2599_v3  ;;  %v1420_v14 = vadd.f32 %v1388_v53, %v2382_v38  ;;  %vm947_vm7 = vcmp.eq.f32.partialorder %v2599_v3, inf  ;;  %1450 = vst [vmem:[#allocation5 + $0xc0] sm:$0xff] %v1418_v7  ;;  %v2951_v25 = vld [vmem:[#allocation48_spill] sm:$0xff] }
 0x17e   :  { %v950_v21 = vand.u32 2147483648, %v2599_v3  ;;  %v1421_v48 = vadd.f32 %v1389_v13, %v2467_v16  ;;  %1451 = vst [vmem:[#allocation5 + $0xc8] sm:$0xff] %v1419_v58  ;;  %v739_v42 = vmul.f32 %v2658_v45, %v2658_v45  ;;  %v1598_v32 = vpop.eup %1597  ;;  %1433 = vst [vmem:[#allocation5 + $0x38] sm:$0xff] %v1401_v36  ;;  %vm949_vm8 = vcmp.eq.f32.partialorder %v2599_v3, 0.0  ;;  %v2950_v13 = vld [vmem:[#allocation35_spill] sm:$0xff] }
 0x17f   :  { %v1147_v4 = vsub.f32 %v1083_v37, %v1115_v24  ;;  %v948_v9 = vsel %vm947_vm7, %v2599_v3, %v946_v23  ;;  %v1084_v38 = vmul.f32 -0.122417435, %v2544_v49  ;;  %1452 = vst [vmem:[#allocation5 + $0xd0] sm:$0xff] %v1420_v14  ;;  %v939_v43 = vmul.f32 %v1598_v32, %v2609_v61  ;;  %v2946_v3 = vld [vmem:[#allocation32_spill] sm:$0xff] }
 0x180   :  { %v951_v6 = vsel %vm949_vm8, %v950_v21, %v948_v9  ;;  %vm940_vm9 = vcmp.eq.f32.partialorder %v2609_v61, inf  ;;  %1453 = vst [vmem:[#allocation5 + $0xd8] sm:$0xff] %v1421_v48  ;;  %v771_v16 = vsub.f32 1.0, %v739_v42  ;;  %v943_v47 = vand.u32 2147483648, %v2609_v61 }
 0x181   :  { %v1211_v51 = vsel %vm1179_vm3, %v1147_v4, -0.23971277  ;;  %v1117_v57 = vmul.f32 0.47942555, %v951_v6  ;;  %v2677_v27 = vmul.f32 %v2925_v5, %v2185_v29  ;;  %v941_v63 = vsel %vm940_vm9, %v2609_v61, %v939_v43 }
 0x182   :  { %v1374_v50 = vmul.f32 %v2946_v3, %v1211_v51  ;;  %vm942_vm10 = vcmp.eq.f32.partialorder %v2609_v61, 0.0  ;;  %v803_v30 = vmax.f32 %v771_v16, 0.0  ;;  %vm954_vm11 = vcmp.eq.f32.partialorder %v2628_v26, inf  ;;  %v2953_v51 = vld [vmem:[#allocation49_spill] sm:$0xff] }
 0x183   :  { %v1600_v56 = vpop.eup %1599  ;;  %v1149_v37 = vsub.f32 %v1085_v62, %v1117_v57  ;;  %v944_v55 = vsel %vm942_vm10, %v943_v47, %v941_v63  ;;  %v741_v12 = vmul.f32 %v2677_v27, %v2677_v27  ;;  %vm956_vm12 = vcmp.eq.f32.partialorder %v2628_v26, 0.0 }
 0x184   :  { %v1406_v52 = vadd.f32 %v1374_v50, %v2626_v31  ;;  %v1116_v2 = vmul.f32 0.47942555, %v944_v55  ;;  %v953_v29 = vmul.f32 %v1600_v56, %v2628_v26  ;;  %v835_v34 = vmin.f32 %v803_v30, 1.0 }
 0x185   :  { %v1213_v19 = vsel %vm1181_vm6, %v1149_v37, -0.23971277  ;;  %v957_v61 = vand.u32 2147483648, %v2628_v26  ;;  %v773_v62 = vsub.f32 1.0, %v741_v12  ;;  %vm1180_vm13 = vcmp.gt.f32.partialorder %v2544_v49, -0.87758255 }
 0x186   :  { %1438 = vst [vmem:[#allocation5 + $0x60] sm:$0xff] %v1406_v52  ;;  %v1376_v28 = vmul.f32 %v2947_v60, %v1213_v19  ;;  %v1148_v11 = vsub.f32 %v1084_v38, %v1116_v2  ;;  %v955_v18 = vsel %vm954_vm11, %v2628_v26, %v953_v29  ;;  %1601 = vrsqrt.f32 %v835_v34  ;;  %v2956_v29 = vld [vmem:[#allocation17_spill] sm:$0xff] }
 0x187   :  { %v958_v31 = vsel %vm956_vm12, %v957_v61, %v955_v18  ;;  %v1086_v20 = vmul.f32 -0.122417435, %v2573_v15  ;;  %vm1281_vm14 = vcmp.eq.s32.totalorder %v2949_v59, %v2948_v40  ;;  %v805_v53 = vmax.f32 %v773_v62, 0.0 }
 0x188   :  { %v1408_v46 = vadd.f32 %v1376_v28, %v2635_v33  ;;  %v1212_v1 = vsel %vm1180_vm13, %v1148_v11, -0.23971277  ;;  %v1118_v22 = vmul.f32 0.47942555, %v958_v31  ;;  %v1311_v39 = vmul.f32 30.0, %v2544_v49 }
 0x189   :  { %v1375_v41 = vmul.f32 %v2950_v13, %v1212_v1  ;;  %v2702_v26 = vmul.f32 %v2927_v10, %v2951_v25  ;;  %v2952_v58 = vmov 0.0029296875   ;;  %v837_v24 = vmin.f32 %v805_v53, 1.0 }
 0x18a   :  { %1440 = vst [vmem:[#allocation5 + $0x70] sm:$0xff] %v1408_v46  ;;  %v1150_v7 = vsub.f32 %v1086_v20, %v1118_v22  ;;  %v1345_v36 = vsel %vm1281_vm14, 27.00293, %v2952_v58  ;;  %v2707_v23 = vmul.f32 %v2929_v44, %v2205_v35  ;;  %vm1182_vm15 = vcmp.gt.f32.partialorder %v2573_v15, -0.87758255  ;;  %v2957_v46 = vld [vmem:[#allocation18_spill] sm:$0xff] }
 0x18b   :  { %v1407_v33 = vadd.f32 %v1375_v41, %v1311_v39  ;;  %v740_v49 = vmul.f32 %v2702_v26, %v2702_v26  ;;  %1603 = vrsqrt.f32 %v837_v24  ;;  %v1313_v21 = vmul.f32 30.0, %v2573_v15 }
 0x18c   :  { %v1214_v14 = vsel %vm1182_vm15, %v1150_v7, -0.23971277  ;;  %v742_v32 = vmul.f32 %v2707_v23, %v2707_v23  ;;  %v2717_v35 = vmul.f32 %v2919_v17, %v2207_v8  ;;  %v2725_v57 = vmul.f32 %v2925_v5, %v2953_v51  ;;  %v2954_v8 = vld [vmem:[#allocation9_spill] sm:$0xff]  ;;  %v2955_v17 = vld [vmem:[#allocation15_spill] sm:$0xff] }
 0x18d   :  { %1439 = vst [vmem:[#allocation5 + $0x68] sm:$0xff] %v1407_v33  ;;  %v1377_v48 = vmul.f32 %v1345_v36, %v1214_v14  ;;  %v772_v42 = vsub.f32 1.0, %v740_v49  ;;  %vm989_vm0 = vcmp.eq.f32.partialorder %v835_v34, inf  ;;  %v992_v47 = vand.u32 2147483648, %v835_v34 }
 0x18e   :  { %v774_v6 = vsub.f32 1.0, %v742_v32  ;;  %v747_v15 = vmul.f32 %v2717_v35, %v2717_v35  ;;  %vm991_vm1 = vcmp.eq.f32.partialorder %v835_v34, 0.0  ;;  %vm1286_vm2 = vcmp.eq.s32.totalorder %v2955_v17, %v2954_v8 }
 0x18f   :  { %v1409_v4 = vadd.f32 %v1377_v48, %v1313_v21  ;;  %v804_v9 = vmax.f32 %v772_v42, 0.0  ;;  %v1091_v37 = vmul.f32 -0.122417435, %v2658_v45  ;;  %vm1187_vm3 = vcmp.gt.f32.partialorder %v2658_v45, -0.87758255 }
 0x190   :  { %v1602_v38 = vpop.eup %1601  ;;  %v806_v3 = vmax.f32 %v774_v6, 0.0  ;;  %v779_v56 = vsub.f32 1.0, %v747_v15  ;;  %v749_v5 = vmul.f32 %v2725_v57, %v2725_v57  ;;  %v1318_v52 = vmul.f32 30.0, %v2658_v45 }
 0x191   :  { %1441 = vst [vmem:[#allocation5 + $0x78] sm:$0xff] %v1409_v4  ;;  %v988_v43 = vmul.f32 %v1602_v38, %v835_v34  ;;  %v2719_v16 = vmin.f32 %v804_v9, 1.0  ;;  %v1350_v2 = vsel %vm1286_vm2, 27.00293, %v2952_v58  ;;  %vm1288_vm4 = vcmp.eq.s32.totalorder %v2956_v29, %v2954_v8 }
 0x192   :  { %v2730_v30 = vmin.f32 %v806_v3, 1.0  ;;  %v811_v61 = vmax.f32 %v779_v56, 0.0  ;;  %v781_v62 = vsub.f32 1.0, %v749_v5  ;;  %vm1003_vm5 = vcmp.eq.f32.partialorder %v837_v24, inf }
 0x193   :  { %v990_v50 = vsel %vm989_vm0, %v835_v34, %v988_v43  ;;  %1605 = vrsqrt.f32 %v2719_v16  ;;  %vm1005_vm6 = vcmp.eq.f32.partialorder %v837_v24, 0.0  ;;  %v1006_v60 = vand.u32 2147483648, %v837_v24 }
 0x194   :  { %v993_v63 = vsel %vm991_vm1, %v992_v47, %v990_v50  ;;  %1607 = vrsqrt.f32 %v2730_v30  ;;  %v2743_v28 = vmul.f32 %v2927_v10, %v2218_v54  ;;  %v2745_v18 = vmin.f32 %v811_v61, 1.0 }
 0x195   :  { %v1123_v55 = vmul.f32 0.47942555, %v993_v63  ;;  %v1604_v12 = vpop.eup %1603  ;;  %v813_v31 = vmax.f32 %v781_v62, 0.0  ;;  %vm1287_vm7 = vcmp.eq.s32.totalorder %v2957_v46, %v2954_v8  ;;  %v1093_v22 = vmul.f32 -0.122417435, %v2677_v27 }
 0x196   :  { %v1002_v19 = vmul.f32 %v1604_v12, %v837_v24  ;;  %v748_v1 = vmul.f32 %v2743_v28, %v2743_v28  ;;  %v1352_v54 = vsel %vm1288_vm4, 27.00293, %v2952_v58  ;;  %1609 = vrsqrt.f32 %v2745_v18 }
 0x197   :  { %v1155_v34 = vsub.f32 %v1091_v37, %v1123_v55  ;;  %vm1189_vm8 = vcmp.gt.f32.partialorder %v2677_v27, -0.87758255  ;;  %v2758_v39 = vmin.f32 %v813_v31, 1.0  ;;  %v1320_v7 = vmul.f32 30.0, %v2677_v27 }
 0x198   :  { %v1004_v45 = vsel %vm1003_vm5, %v837_v24, %v1002_v19  ;;  %v780_v13 = vsub.f32 1.0, %v748_v1  ;;  %v1351_v36 = vsel %vm1287_vm7, 27.00293, %v2952_v58  ;;  %vm1289_vm9 = vcmp.eq.s32.totalorder %v2949_v59, %v2954_v8  ;;  %v2958_v1 = vld [vmem:[#allocation21_spill] sm:$0xff] }
 0x199   :  { %v1219_v11 = vsel %vm1187_vm3, %v1155_v34, -0.23971277  ;;  %v1007_v40 = vsel %vm1005_vm6, %v1006_v60, %v1004_v45  ;;  %vm996_vm10 = vcmp.eq.f32.partialorder %v2719_v16, inf  ;;  %v1092_v33 = vmul.f32 -0.122417435, %v2702_v26 }
 0x19a   :  { %v1382_v20 = vmul.f32 %v1350_v2, %v1219_v11  ;;  %v1125_v53 = vmul.f32 0.47942555, %v1007_v40  ;;  %1611 = vrsqrt.f32 %v2758_v39  ;;  %v999_v14 = vand.u32 2147483648, %v2719_v16 }
 0x19b   :  { %v812_v21 = vmax.f32 %v780_v13, 0.0  ;;  %v2771_v27 = vmul.f32 %v2929_v44, %v2226_v0  ;;  %vm998_vm11 = vcmp.eq.f32.partialorder %v2719_v16, 0.0  ;;  %vm1188_vm12 = vcmp.gt.f32.partialorder %v2702_v26, -0.87758255 }
 0x19c   :  { %v1414_v10 = vadd.f32 %v1382_v20, %v1318_v52  ;;  %v1157_v25 = vsub.f32 %v1093_v22, %v1125_v53  ;;  %vm1010_vm13 = vcmp.eq.f32.partialorder %v2730_v30, inf  ;;  %v1013_v0 = vand.u32 2147483648, %v2730_v30 }
 0x19d   :  { %v1606_v41 = vpop.eup %1605  ;;  %v2777_v38 = vmin.f32 %v812_v21, 1.0  ;;  %v750_v6 = vmul.f32 %v2771_v27, %v2771_v27  ;;  %vm1012_vm14 = vcmp.eq.f32.partialorder %v2730_v30, 0.0  ;;  %vm1190_vm15 = vcmp.gt.f32.partialorder %v2707_v23, -0.87758255 }
 0x19e   :  { %1446 = vst [vmem:[#allocation5 + $0xa0] sm:$0xff] %v1414_v10  ;;  %v995_v24 = vmul.f32 %v1606_v41, %v2719_v16  ;;  %v1221_v49 = vsel %vm1189_vm8, %v1157_v25, -0.23971277  ;;  %v1608_v48 = vpop.eup %1607  ;;  %v1319_v63 = vmul.f32 30.0, %v2702_v26  ;;  %v1321_v37 = vmul.f32 30.0, %v2707_v23 }
 0x19f   :  { %v1384_v42 = vmul.f32 %v1352_v54, %v1221_v49  ;;  %v1009_v9 = vmul.f32 %v1608_v48, %v2730_v30  ;;  %1613 = vrsqrt.f32 %v2777_v38  ;;  %v782_v3 = vsub.f32 1.0, %v750_v6 }
 0x1a0   :  { %v997_v32 = vsel %vm996_vm10, %v2719_v16, %v995_v24  ;;  %v1094_v16 = vmul.f32 -0.122417435, %v2707_v23  ;;  %v1610_v50 = vpop.eup %1609  ;;  %v1099_v12 = vmul.f32 -0.122417435, %v2717_v35  ;;  %vm1045_vm0 = vcmp.eq.f32.partialorder %v2745_v18, inf }
 0x1a1   :  { %v1000_v4 = vsel %vm998_vm11, %v999_v14, %v997_v32  ;;  %v1416_v43 = vadd.f32 %v1384_v42, %v1320_v7  ;;  %v1011_v44 = vsel %vm1010_vm13, %v2730_v30, %v1009_v9  ;;  %v1353_v30 = vsel %vm1289_vm9, 27.00293, %v2952_v58 }
 0x1a2   :  { %v1124_v15 = vmul.f32 0.47942555, %v1000_v4  ;;  %v1014_v47 = vsel %vm1012_vm14, %v1013_v0, %v1011_v44  ;;  %v1044_v5 = vmul.f32 %v1610_v50, %v2745_v18  ;;  %v814_v52 = vmax.f32 %v782_v3, 0.0 }
 0x1a3   :  { %1448 = vst [vmem:[#allocation5 + $0xb0] sm:$0xff] %v1416_v43  ;;  %v1126_v56 = vmul.f32 0.47942555, %v1014_v47  ;;  %v1048_v19 = vand.u32 2147483648, %v2745_v18  ;;  %vm1047_vm1 = vcmp.eq.f32.partialorder %v2745_v18, 0.0  ;;  %vm1059_vm2 = vcmp.eq.f32.partialorder %v2758_v39, inf }
 0x1a4   :  { %v1156_v51 = vsub.f32 %v1092_v33, %v1124_v15  ;;  %v1612_v61 = vpop.eup %1611  ;;  %v1046_v62 = vsel %vm1045_vm0, %v2745_v18, %v1044_v5  ;;  %v846_v26 = vmin.f32 %v814_v52, 1.0  ;;  %v1062_v40 = vand.u32 2147483648, %v2758_v39 }
 0x1a5   :  { %v1158_v34 = vsub.f32 %v1094_v16, %v1126_v56  ;;  %v1049_v11 = vsel %vm1047_vm1, %v1048_v19, %v1046_v62  ;;  %v1058_v45 = vmul.f32 %v1612_v61, %v2758_v39  ;;  %vm1294_vm3 = vcmp.eq.s32.totalorder %v2955_v17, %v2958_v1 }
 0x1a6   :  { %v1220_v55 = vsel %vm1188_vm12, %v1156_v51, -0.23971277  ;;  %v1131_v20 = vmul.f32 0.47942555, %v1049_v11  ;;  %1615 = vrsqrt.f32 %v846_v26  ;;  %vm1061_vm4 = vcmp.eq.f32.partialorder %v2758_v39, 0.0 }
 0x1a7   :  { %v1383_v2 = vmul.f32 %v1351_v36, %v1220_v55  ;;  %v1222_v60 = vsel %vm1190_vm15, %v1158_v34, -0.23971277  ;;  %v1060_v18 = vsel %vm1059_vm2, %v2758_v39, %v1058_v45  ;;  %vm1195_vm5 = vcmp.gt.f32.partialorder %v2717_v35, -0.87758255 }
 0x1a8   :  { %v1385_v31 = vmul.f32 %v1353_v30, %v1222_v60  ;;  %v1163_v53 = vsub.f32 %v1099_v12, %v1131_v20  ;;  %v1063_v23 = vsel %vm1061_vm4, %v1062_v40, %v1060_v18  ;;  %v1101_v10 = vmul.f32 -0.122417435, %v2725_v57 }
 0x1a9   :  { %v1415_v8 = vadd.f32 %v1383_v2, %v1319_v63  ;;  %v1614_v54 = vpop.eup %1613  ;;  %v1133_v13 = vmul.f32 0.47942555, %v1063_v23  ;;  %vm1296_vm6 = vcmp.eq.s32.totalorder %v2956_v29, %v2958_v1  ;;  %v1326_v17 = vmul.f32 30.0, %v2717_v35 }
 0x1aa   :  { %v1417_v22 = vadd.f32 %v1385_v31, %v1321_v37  ;;  %v1227_v41 = vsel %vm1195_vm5, %v1163_v53, -0.23971277  ;;  %v1358_v25 = vsel %vm1294_vm3, 27.00293, %v2952_v58  ;;  %v1051_v39 = vmul.f32 %v1614_v54, %v2777_v38 }
 0x1ab   :  { %1447 = vst [vmem:[#allocation5 + $0xa8] sm:$0xff] %v1415_v8  ;;  %v1390_v7 = vmul.f32 %v1358_v25, %v1227_v41  ;;  %v1165_v36 = vsub.f32 %v1101_v10, %v1133_v13  ;;  %vm1052_vm7 = vcmp.eq.f32.partialorder %v2777_v38, inf  ;;  %v1055_v24 = vand.u32 2147483648, %v2777_v38 }
 0x1ac   :  { %1449 = vst [vmem:[#allocation5 + $0xb8] sm:$0xff] %v1417_v22  ;;  %vm1197_vm8 = vcmp.gt.f32.partialorder %v2725_v57, -0.87758255  ;;  %v1053_v33 = vsel %vm1052_vm7, %v2777_v38, %v1051_v39  ;;  %vm1054_vm9 = vcmp.eq.f32.partialorder %v2777_v38, 0.0  ;;  %v1360_v35 = vsel %vm1296_vm6, 27.00293, %v2952_v58 }
 0x1ad   :  { %v1422_v29 = vadd.f32 %v1390_v7, %v1326_v17  ;;  %v1229_v49 = vsel %vm1197_vm8, %v1165_v36, -0.23971277  ;;  %v1056_v14 = vsel %vm1054_vm9, %v1055_v24, %v1053_v33  ;;  %v1328_v21 = vmul.f32 30.0, %v2725_v57 }
 0x1ae   :  { %v1392_v48 = vmul.f32 %v1360_v35, %v1229_v49  ;;  %v1100_v42 = vmul.f32 -0.122417435, %v2743_v28  ;;  %v1132_v32 = vmul.f32 0.47942555, %v1056_v14  ;;  %vm1295_vm10 = vcmp.eq.s32.totalorder %v2957_v46, %v2958_v1 }
 0x1af   :  { %1454 = vst [vmem:[#allocation5 + $0xe0] sm:$0xff] %v1422_v29  ;;  %vm1196_vm11 = vcmp.gt.f32.partialorder %v2743_v28, -0.87758255  ;;  %v1359_v15 = vsel %vm1295_vm10, 27.00293, %v2952_v58  ;;  %vm1066_vm12 = vcmp.eq.f32.partialorder %v846_v26, inf  ;;  %vm1297_vm14 = vcmp.eq.s32.totalorder %v2949_v59, %v2958_v1 }
 0x1b0   :  { %v1616_v4 = vpop.eup %1615  ;;  %v1424_v9 = vadd.f32 %v1392_v48, %v1328_v21  ;;  %v1164_v6 = vsub.f32 %v1100_v42, %v1132_v32  ;;  %v1069_v57 = vand.u32 2147483648, %v846_v26  ;;  %v1327_v0 = vmul.f32 30.0, %v2743_v28 }
 0x1b1   :  { %v1065_v38 = vmul.f32 %v1616_v4, %v846_v26  ;;  %vm1068_vm13 = vcmp.eq.f32.partialorder %v846_v26, 0.0  ;;  %v1102_v46 = vmul.f32 -0.122417435, %v2771_v27  ;;  %vm1198_vm15 = vcmp.gt.f32.partialorder %v2771_v27, -0.87758255 }
 0x1b2   :  { %1456 = vst [vmem:[#allocation5 + $0xf0] sm:$0xff] %v1424_v9  ;;  %v1228_v43 = vsel %vm1196_vm11, %v1164_v6, -0.23971277  ;;  %v1361_v56 = vsel %vm1297_vm14, 27.00293, %v2952_v58  ;;  %v1329_v28 = vmul.f32 30.0, %v2771_v27 }
 0x1b3   :  { %v1391_v44 = vmul.f32 %v1359_v15, %v1228_v43  ;;  %v1067_v16 = vsel %vm1066_vm12, %v846_v26, %v1065_v38 }
 0x1b4   :  { %v1070_v51 = vsel %vm1068_vm13, %v1069_v57, %v1067_v16 }
 0x1b5   :  { %v1423_v47 = vadd.f32 %v1391_v44, %v1327_v0  ;;  %v1134_v3 = vmul.f32 0.47942555, %v1070_v51 }
 0x1b7   :  { %1455 = vst [vmem:[#allocation5 + $0xe8] sm:$0xff] %v1423_v47  ;;  %v1166_v50 = vsub.f32 %v1102_v46, %v1134_v3 }
 0x1b9   :  { %v1230_v63 = vsel %vm1198_vm15, %v1166_v50, -0.23971277 }
 0x1ba   :  { %v1393_v37 = vmul.f32 %v1361_v56, %v1230_v63 }
 0x1bc   :  { %v1425_v30 = vadd.f32 %v1393_v37, %v1329_v28 }
 0x1be   :  { %1457 = vst [vmem:[#allocation5 + $0xf8] sm:$0xff] %v1425_v30 }
 0x1bf   :  { %1650 = shalt.err (!%p1647_p12)
}
 0x1c0   :  { %s1651_s18 = scalar_lea.hbm %s2853_s4, 4096 }
 0x1c1   :  { %p1652_p13 = scmp.ne.s32.totalorder %s2853_s4, %s1651_s18  ;;  %p1655_p0 = scmp.lt.u32.totalorder %s1651_s18, %s2853_s4 }
 0x1c3   :  { %p1657_p1 = pnand %p1655_p0, %p1652_p13 }
 0x1c5   :  { %1660 = shalt.err (!%p1657_p1)
}
 0x1c6   :  { %s1671_s23 = smov 1024   ;;  %s1672_s24 = smov 64  }
 0x1c7   :  { %1469 = dma.vmem_to_hbm [thread:$0]  %s1464_s14, 4096, %s2853_s4, [#allocation4], %s1671_s23, %s1671_s23, %s1672_s24  }
 0x1c8   :  { %1663 = dma.done.wait [#allocation4], 4096  }
 0x1c9   :  { %1664 = vsyncadd [#allocation4], 4294963200 }
 0x1ca   :  { %1473 = vsyncpa [#allocation3], 1 }
 0x1cb   :  { %1474 = vsyncpa [#allocation4], 1 }

</bundles_post_ra>
